<compile_context>
chip_gen: v5e
topology: v5e:2x2
jax: 0.10.0
libtpu: 0.0.40
codegen_flags: <defaults>
</compile_context>

<pallas_src>
import jax
import jax.numpy as jnp
from jax.experimental import pallas as pl
from jax.experimental.pallas import tpu as pltpu

# config['weights']['perceptual'][...] — deterministic synthetic config.
ARCFACE_WEIGHT = 10.0
IMAGENET_WEIGHT = 1.0
GAZE_WEIGHT = 5.0

# Synthetic feature dims (stand-ins for the real backbones).
D_ARC = 128    # arcface embedding dim
D_IN = 128     # resnet18 output dim
D_GAZE = 8     # gaze vector dim (zero-padded to 128 lanes inside the fused W)

LANES = 128
TK_MAX = 8192                 # max K tile; v7x-safe (raise to 16384 on v5e/v6e)
N_SPLIT = 2                   # parallel K split -> uses both TCs on v7x
VMEM_LIMIT = 48 * 1024 * 1024  # < 64 MiB physical on v7x; > 16 MiB v5e default


def _round_up(x, m):
    return (x + m - 1) // m * m


# ---------------------------------------------------------------------------
# Stage 1: K-tiled bf16 matmul, f32 VMEM accumulators resident across the
# (arbitrary) K axis; each "parallel" slice p writes its own partial result.
#   p/s/d_ref : [B, TK]   bf16     w_ref : [TK, 384] bf16
#   outputs   : [N_SPLIT, B, 384] f32 (block (1, B, 384) indexed by p)
# ---------------------------------------------------------------------------
def _matmul_kernel(p_ref, s_ref, d_ref, w_ref, po_ref, so_ref, do_ref,
                   accp, accs, accd):
    k = pl.program_id(1)

    @pl.when(k == 0)
    def _():
        accp[...] = jnp.zeros_like(accp)
        accs[...] = jnp.zeros_like(accs)
        accd[...] = jnp.zeros_like(accd)

    w = w_ref[...]
    accp[...] += jnp.dot(p_ref[...], w, preferred_element_type=jnp.float32)
    accs[...] += jnp.dot(s_ref[...], w, preferred_element_type=jnp.float32)
    accd[...] += jnp.dot(d_ref[...], w, preferred_element_type=jnp.float32)

    @pl.when(k == pl.num_programs(1) - 1)
    def _():
        po_ref[0] = accp[...]
        so_ref[0] = accs[...]
        do_ref[0] = accd[...]


# ---------------------------------------------------------------------------
# Stage 2: tiny epilogue — sum the N_SPLIT partials and run the full
# PerceptualLoss reduction.  Output f32[4] = [total, Lface, Lin, Lgaze] (SMEM).
# ---------------------------------------------------------------------------
def _make_epilogue_kernel(n_split, d_arc, d_in):
    c_in0, c_in1 = d_arc, d_arc + d_in
    c_gz0 = d_arc + d_in

    def kernel(pp_ref, sp_ref, dp_ref, out_ref):
        eps = 1e-8
        pred = pp_ref[0]
        src = sp_ref[0]
        drv = dp_ref[0]
        for i in range(1, n_split):
            pred = pred + pp_ref[i]
            src = src + sp_ref[i]
            drv = drv + dp_ref[i]

        # Lface = mean_b(1 - cos(pred_arc, src_arc))   (target = +1)
        pa = pred[:, 0:d_arc]
        ta = src[:, 0:d_arc]
        dot = jnp.sum(pa * ta, axis=1, keepdims=True)
        na = jnp.sqrt(jnp.sum(pa * pa, axis=1, keepdims=True))
        nb = jnp.sqrt(jnp.sum(ta * ta, axis=1, keepdims=True))
        # PyTorch clamps the *product* of the norms with eps.
        cos = dot / jnp.maximum(na * nb, eps)
        lface = jnp.mean(1.0 - cos) * ARCFACE_WEIGHT

        # Lin = mean_b ||pred_in - src_in||_2
        di = pred[:, c_in0:c_in1] - src[:, c_in0:c_in1]
        lin = jnp.mean(jnp.sqrt(jnp.sum(di * di, axis=1, keepdims=True)))
        lin = lin * IMAGENET_WEIGHT

        # Lgaze = mean_b ||gaze(pred) - gaze(driver)||_2
        # (zero-padded gaze lanes are exactly zero -> contribute nothing)
        dg = pred[:, c_gz0:] - drv[:, c_gz0:]
        lgaze = jnp.mean(jnp.sqrt(jnp.sum(dg * dg, axis=1, keepdims=True)))
        lgaze = lgaze * GAZE_WEIGHT

        out_ref[0] = lface + lin + lgaze
        out_ref[1] = lface
        out_ref[2] = lin
        out_ref[3] = lgaze

    return kernel


# ---------------------------------------------------------------------------
# Factory: packs the fused bf16 weight slab ONCE (outside the per-call path)
# and returns a jitted loss_fn(source, driver, pred) -> (total, components).
# ---------------------------------------------------------------------------
def make_perceptual_loss_fn(w_arc, w_in, w_gaze, *, tk_max=TK_MAX,
                            n_split=N_SPLIT):
    d_img, d_arc = w_arc.shape
    d_in = w_in.shape[1]
    d_gaze = w_gaze.shape[1]

    # ---- K-tiling geometry: big tiles, minimal zero-pad -------------------
    k128 = _round_up(d_img, LANES)
    nk = max(-(-k128 // tk_max), 1)        # number of K tiles
    nk = _round_up(nk, n_split)            # evenly divisible across the split
    tk = _round_up(-(-k128 // nk), LANES)  # tile size, multiple of 128
    k_total = nk * tk                      # padded K (waste < nk*128 cols)
    nk_per_split = nk // n_split

    # ---- one-time weight prepack: concat + lane-pad gaze + K-pad + bf16 ---
    d_gaze_pad = _round_up(d_gaze, LANES)
    w_gaze_p = jnp.pad(w_gaze, ((0, 0), (0, d_gaze_pad - d_gaze)))
    w = jnp.concatenate([w_arc, w_in, w_gaze_p], axis=1)
    w = jnp.pad(w, ((0, k_total - d_img), (0, 0))).astype(jnp.bfloat16)
    d_out = int(w.shape[1])                # 384 = 3 * 128 (lane-dense)

    epilogue_kernel = _make_epilogue_kernel(n_split, d_arc, d_in)

    def loss_fn(source, driver, pred):
        b = source.shape[0]

        def prep(img):  # [B,C,H,W] -> [B, K_total] bf16 (cast before pad)
            flat = img.reshape(b, -1).astype(jnp.bfloat16)
            return jnp.pad(flat, ((0, 0), (0, k_total - d_img)))

        xp, xs, xd = prep(pred), prep(source), prep(driver)

        x_spec = pl.BlockSpec((b, tk), lambda p, k: (0, p * nk_per_split + k))
        w_spec = pl.BlockSpec((tk, d_out),
                              lambda p, k: (p * nk_per_split + k, 0))
        out_spec = pl.BlockSpec((1, b, d_out), lambda p, k: (p, 0, 0))

        cost = pl.CostEstimate(
            flops=2 * 3 * b * k_total * d_out,
            transcendentals=0,
            bytes_accessed=(3 * b * k_total + k_total * d_out) * 2
                           + 3 * n_split * b * d_out * 4,
        )

        partials = pl.pallas_call(
            _matmul_kernel,
            out_shape=[jax.ShapeDtypeStruct((n_split, b, d_out), jnp.float32)
                       for _ in range(3)],
            grid_spec=pltpu.PrefetchScalarGridSpec(
                num_scalar_prefetch=0,
                grid=(n_split, nk_per_split),
                in_specs=[x_spec, x_spec, x_spec, w_spec],
                out_specs=[out_spec, out_spec, out_spec],
                scratch_shapes=[pltpu.VMEM((b, d_out), jnp.float32)
                                for _ in range(3)],
            ),
            compiler_params=pltpu.CompilerParams(
                dimension_semantics=("parallel", "arbitrary"),
                vmem_limit_bytes=VMEM_LIMIT,
            ),
            cost_estimate=cost,
        )(xp, xs, xd, w)

        p_part, s_part, d_part = partials

        out = pl.pallas_call(
            epilogue_kernel,
            out_shape=jax.ShapeDtypeStruct((4,), jnp.float32),
            in_specs=[pl.BlockSpec(memory_space=pltpu.MemorySpace.VMEM)
                      for _ in range(3)],
            out_specs=pl.BlockSpec(memory_space=pltpu.MemorySpace.SMEM),
        )(p_part, s_part, d_part)

        total = out[0]
        components = {"Lface": out[1], "Lin": out[2], "Lgaze": out[3]}
        return total, components

    return jax.jit(loss_fn)


if __name__ == "__main__":
    key = jax.random.PRNGKey(0)
    B, C, H, W = 2, 3, 16, 16
    d_img = C * H * W

    ks = jax.random.split(key, 6)
    source = jax.random.normal(ks[0], (B, C, H, W), dtype=jnp.float32)
    driver = jax.random.normal(ks[1], (B, C, H, W), dtype=jnp.float32)
    pred = jax.random.normal(ks[2], (B, C, H, W), dtype=jnp.float32)

    # Deterministic synthetic projection weights (stand-in backbones).
    w_arc = 0.02 * jax.random.normal(ks[3], (d_img, D_ARC), dtype=jnp.float32)
    w_in = 0.02 * jax.random.normal(ks[4], (d_img, D_IN), dtype=jnp.float32)
    w_gaze = 0.02 * jax.random.normal(ks[5], (d_img, D_GAZE), dtype=jnp.float32)

    loss_fn = make_perceptual_loss_fn(w_arc, w_in, w_gaze)
    total, comps = loss_fn(source, driver, pred)

    jax.block_until_ready(total)
    jax.block_until_ready(comps["Lface"])
    jax.block_until_ready(comps["Lin"])
    jax.block_until_ready(comps["Lgaze"])

    print("KERNEL_OK")
</pallas_src>

<mosaic_0001>
module attributes {stable_mosaic.version = 11 : i64} {
  func.func @_matmul_kernel(%arg0: i32, %arg1: i32, %arg2: memref<2x384xbf16, #tpu.memory_space<vmem>>, %arg3: memref<2x384xbf16, #tpu.memory_space<vmem>>, %arg4: memref<2x384xbf16, #tpu.memory_space<vmem>>, %arg5: memref<384x384xbf16, #tpu.memory_space<vmem>>, %arg6: memref<1x2x384xf32, #tpu.memory_space<vmem>>, %arg7: memref<1x2x384xf32, #tpu.memory_space<vmem>>, %arg8: memref<1x2x384xf32, #tpu.memory_space<vmem>>, %arg9: memref<2x384xf32, #tpu.memory_space<vmem>>, %arg10: memref<2x384xf32, #tpu.memory_space<vmem>>, %arg11: memref<2x384xf32, #tpu.memory_space<vmem>>) attributes {dimension_semantics = [#tpu.dimension_semantics<parallel>, #tpu.dimension_semantics<arbitrary>], iteration_bounds = array<i64: 2, 1>, scalar_prefetch = 0 : i64, scratch_operands = 3 : i64, tpu.core_type = #tpu.core_type<tc>, window_params = [{transform_indices = @transform_0, window_bounds = array<i64: 2, 384>}, {transform_indices = @transform_1, window_bounds = array<i64: 2, 384>}, {transform_indices = @transform_2, window_bounds = array<i64: 2, 384>}, {transform_indices = @transform_3, window_bounds = array<i64: 384, 384>}, {transform_indices = @transform_4, window_bounds = array<i64: 1, 2, 384>}, {transform_indices = @transform_5, window_bounds = array<i64: 1, 2, 384>}, {transform_indices = @transform_6, window_bounds = array<i64: 1, 2, 384>}]} {
    %c0_i32 = arith.constant 0 : i32
    %0 = arith.cmpi eq, %arg1, %c0_i32 : i32
    %1 = arith.extui %0 : i1 to i32
    %c0_i32_0 = arith.constant 0 : i32
    %2 = arith.cmpi ne, %1, %c0_i32_0 : i32
    scf.if %2 {
      %cst_24 = arith.constant 0.000000e+00 : f32
      %22 = vector.broadcast %cst_24 : f32 to vector<2x384xf32>
      %c0_25 = arith.constant 0 : index
      %c0_26 = arith.constant 0 : index
      %23 = vector.load %arg9[%c0_25, %c0_26] : memref<2x384xf32, #tpu.memory_space<vmem>>, vector<2x384xf32>
      tpu.vector_store %arg9[%c0_25, %c0_26], %22 {strides = array<i32>} : memref<2x384xf32, #tpu.memory_space<vmem>>, vector<2x384xf32>,
      %cst_27 = arith.constant 0.000000e+00 : f32
      %24 = vector.broadcast %cst_27 : f32 to vector<2x384xf32>
      %c0_28 = arith.constant 0 : index
      %c0_29 = arith.constant 0 : index
      %25 = vector.load %arg10[%c0_28, %c0_29] : memref<2x384xf32, #tpu.memory_space<vmem>>, vector<2x384xf32>
      tpu.vector_store %arg10[%c0_28, %c0_29], %24 {strides = array<i32>} : memref<2x384xf32, #tpu.memory_space<vmem>>, vector<2x384xf32>,
      %cst_30 = arith.constant 0.000000e+00 : f32
      %26 = vector.broadcast %cst_30 : f32 to vector<2x384xf32>
      %c0_31 = arith.constant 0 : index
      %c0_32 = arith.constant 0 : index
      %27 = vector.load %arg11[%c0_31, %c0_32] : memref<2x384xf32, #tpu.memory_space<vmem>>, vector<2x384xf32>
      tpu.vector_store %arg11[%c0_31, %c0_32], %26 {strides = array<i32>} : memref<2x384xf32, #tpu.memory_space<vmem>>, vector<2x384xf32>,
    } else {
    }
    %c0 = arith.constant 0 : index
    %c0_1 = arith.constant 0 : index
    %3 = vector.load %arg5[%c0, %c0_1] : memref<384x384xbf16, #tpu.memory_space<vmem>>, vector<384x384xbf16>
    %c0_2 = arith.constant 0 : index
    %c0_3 = arith.constant 0 : index
    %4 = vector.load %arg9[%c0_2, %c0_3] : memref<2x384xf32, #tpu.memory_space<vmem>>, vector<2x384xf32>
    %c0_4 = arith.constant 0 : index
    %c0_5 = arith.constant 0 : index
    %5 = vector.load %arg2[%c0_4, %c0_5] : memref<2x384xbf16, #tpu.memory_space<vmem>>, vector<2x384xbf16>
    %cst = arith.constant dense<0.000000e+00> : vector<2x384xf32>
    %6 = tpu.matmul %5, %3, %cst {dimension_numbers = #tpu.dot_dimension_numbers<[1], [0], [0], [1], [0, 0, 1, 1], [], []>} : vector<2x384xbf16>, vector<384x384xbf16>, vector<2x384xf32> -> vector<2x384xf32>
    %7 = arith.addf %4, %6 : vector<2x384xf32>
    %c0_6 = arith.constant 0 : index
    %c0_7 = arith.constant 0 : index
    %8 = vector.load %arg9[%c0_6, %c0_7] : memref<2x384xf32, #tpu.memory_space<vmem>>, vector<2x384xf32>
    tpu.vector_store %arg9[%c0_6, %c0_7], %7 {strides = array<i32>} : memref<2x384xf32, #tpu.memory_space<vmem>>, vector<2x384xf32>,
    %c0_8 = arith.constant 0 : index
    %c0_9 = arith.constant 0 : index
    %9 = vector.load %arg10[%c0_8, %c0_9] : memref<2x384xf32, #tpu.memory_space<vmem>>, vector<2x384xf32>
    %c0_10 = arith.constant 0 : index
    %c0_11 = arith.constant 0 : index
    %10 = vector.load %arg3[%c0_10, %c0_11] : memref<2x384xbf16, #tpu.memory_space<vmem>>, vector<2x384xbf16>
    %cst_12 = arith.constant dense<0.000000e+00> : vector<2x384xf32>
    %11 = tpu.matmul %10, %3, %cst_12 {dimension_numbers = #tpu.dot_dimension_numbers<[1], [0], [0], [1], [0, 0, 1, 1], [], []>} : vector<2x384xbf16>, vector<384x384xbf16>, vector<2x384xf32> -> vector<2x384xf32>
    %12 = arith.addf %9, %11 : vector<2x384xf32>
    %c0_13 = arith.constant 0 : index
    %c0_14 = arith.constant 0 : index
    %13 = vector.load %arg10[%c0_13, %c0_14] : memref<2x384xf32, #tpu.memory_space<vmem>>, vector<2x384xf32>
    tpu.vector_store %arg10[%c0_13, %c0_14], %12 {strides = array<i32>} : memref<2x384xf32, #tpu.memory_space<vmem>>, vector<2x384xf32>,
    %c0_15 = arith.constant 0 : index
    %c0_16 = arith.constant 0 : index
    %14 = vector.load %arg11[%c0_15, %c0_16] : memref<2x384xf32, #tpu.memory_space<vmem>>, vector<2x384xf32>
    %c0_17 = arith.constant 0 : index
    %c0_18 = arith.constant 0 : index
    %15 = vector.load %arg4[%c0_17, %c0_18] : memref<2x384xbf16, #tpu.memory_space<vmem>>, vector<2x384xbf16>
    %cst_19 = arith.constant dense<0.000000e+00> : vector<2x384xf32>
    %16 = tpu.matmul %15, %3, %cst_19 {dimension_numbers = #tpu.dot_dimension_numbers<[1], [0], [0], [1], [0, 0, 1, 1], [], []>} : vector<2x384xbf16>, vector<384x384xbf16>, vector<2x384xf32> -> vector<2x384xf32>
    %17 = arith.addf %14, %16 : vector<2x384xf32>
    %c0_20 = arith.constant 0 : index
    %c0_21 = arith.constant 0 : index
    %18 = vector.load %arg11[%c0_20, %c0_21] : memref<2x384xf32, #tpu.memory_space<vmem>>, vector<2x384xf32>
    tpu.vector_store %arg11[%c0_20, %c0_21], %17 {strides = array<i32>} : memref<2x384xf32, #tpu.memory_space<vmem>>, vector<2x384xf32>,
    %c0_i32_22 = arith.constant 0 : i32
    %19 = arith.cmpi eq, %arg1, %c0_i32_22 : i32
    %20 = arith.extui %19 : i1 to i32
    %c0_i32_23 = arith.constant 0 : i32
    %21 = arith.cmpi ne, %20, %c0_i32_23 : i32
    scf.if %21 {
      %c0_24 = arith.constant 0 : index
      %c0_25 = arith.constant 0 : index
      %22 = vector.load %arg9[%c0_24, %c0_25] : memref<2x384xf32, #tpu.memory_space<vmem>>, vector<2x384xf32>
      %c0_26 = arith.constant 0 : index
      %c0_27 = arith.constant 0 : index
      %c0_28 = arith.constant 0 : index
      %23 = vector.load %arg6[%c0_26, %c0_27, %c0_28] : memref<1x2x384xf32, #tpu.memory_space<vmem>>, vector<1x2x384xf32>
      %24 = vector.shape_cast %23 : vector<1x2x384xf32> to vector<2x384xf32>
      %25 = vector.shape_cast %22 : vector<2x384xf32> to vector<1x2x384xf32>
      tpu.vector_store %arg6[%c0_26, %c0_27, %c0_28], %25 {strides = array<i32>} : memref<1x2x384xf32, #tpu.memory_space<vmem>>, vector<1x2x384xf32>,
      %c0_29 = arith.constant 0 : index
      %c0_30 = arith.constant 0 : index
      %26 = vector.load %arg10[%c0_29, %c0_30] : memref<2x384xf32, #tpu.memory_space<vmem>>, vector<2x384xf32>
      %c0_31 = arith.constant 0 : index
      %c0_32 = arith.constant 0 : index
      %c0_33 = arith.constant 0 : index
      %27 = vector.load %arg7[%c0_31, %c0_32, %c0_33] : memref<1x2x384xf32, #tpu.memory_space<vmem>>, vector<1x2x384xf32>
      %28 = vector.shape_cast %27 : vector<1x2x384xf32> to vector<2x384xf32>
      %29 = vector.shape_cast %26 : vector<2x384xf32> to vector<1x2x384xf32>
      tpu.vector_store %arg7[%c0_31, %c0_32, %c0_33], %29 {strides = array<i32>} : memref<1x2x384xf32, #tpu.memory_space<vmem>>, vector<1x2x384xf32>,
      %c0_34 = arith.constant 0 : index
      %c0_35 = arith.constant 0 : index
      %30 = vector.load %arg11[%c0_34, %c0_35] : memref<2x384xf32, #tpu.memory_space<vmem>>, vector<2x384xf32>
      %c0_36 = arith.constant 0 : index
      %c0_37 = arith.constant 0 : index
      %c0_38 = arith.constant 0 : index
      %31 = vector.load %arg8[%c0_36, %c0_37, %c0_38] : memref<1x2x384xf32, #tpu.memory_space<vmem>>, vector<1x2x384xf32>
      %32 = vector.shape_cast %31 : vector<1x2x384xf32> to vector<2x384xf32>
      %33 = vector.shape_cast %30 : vector<2x384xf32> to vector<1x2x384xf32>
      tpu.vector_store %arg8[%c0_36, %c0_37, %c0_38], %33 {strides = array<i32>} : memref<1x2x384xf32, #tpu.memory_space<vmem>>, vector<1x2x384xf32>,
    } else {
    }
    return
  }
  func.func @transform_0(%arg0: i32, %arg1: i32) -> (i32, i32) {
    %c1_i32 = arith.constant 1 : i32
    %0 = arith.muli %arg0, %c1_i32 : i32
    %1 = arith.addi %0, %arg1 : i32
    %c0_i32 = arith.constant 0 : i32
    %c0_i32_0 = arith.constant 0 : i32
    return %c0_i32, %1 : i32, i32
  }
  func.func @transform_1(%arg0: i32, %arg1: i32) -> (i32, i32) {
    %c1_i32 = arith.constant 1 : i32
    %0 = arith.muli %arg0, %c1_i32 : i32
    %1 = arith.addi %0, %arg1 : i32
    %c0_i32 = arith.constant 0 : i32
    %c0_i32_0 = arith.constant 0 : i32
    return %c0_i32, %1 : i32, i32
  }
  func.func @transform_2(%arg0: i32, %arg1: i32) -> (i32, i32) {
    %c1_i32 = arith.constant 1 : i32
    %0 = arith.muli %arg0, %c1_i32 : i32
    %1 = arith.addi %0, %arg1 : i32
    %c0_i32 = arith.constant 0 : i32
    %c0_i32_0 = arith.constant 0 : i32
    return %c0_i32, %1 : i32, i32
  }
  func.func @transform_3(%arg0: i32, %arg1: i32) -> (i32, i32) {
    %c1_i32 = arith.constant 1 : i32
    %0 = arith.muli %arg0, %c1_i32 : i32
    %1 = arith.addi %0, %arg1 : i32
    %c0_i32 = arith.constant 0 : i32
    %c0_i32_0 = arith.constant 0 : i32
    return %1, %c0_i32 : i32, i32
  }
  func.func @transform_4(%arg0: i32, %arg1: i32) -> (i32, i32, i32) {
    %c0_i32 = arith.constant 0 : i32
    %c0_i32_0 = arith.constant 0 : i32
    %c0_i32_1 = arith.constant 0 : i32
    return %arg0, %c0_i32, %c0_i32_0 : i32, i32, i32
  }
  func.func @transform_5(%arg0: i32, %arg1: i32) -> (i32, i32, i32) {
    %c0_i32 = arith.constant 0 : i32
    %c0_i32_0 = arith.constant 0 : i32
    %c0_i32_1 = arith.constant 0 : i32
    return %arg0, %c0_i32, %c0_i32_0 : i32, i32, i32
  }
  func.func @transform_6(%arg0: i32, %arg1: i32) -> (i32, i32, i32) {
    %c0_i32 = arith.constant 0 : i32
    %c0_i32_0 = arith.constant 0 : i32
    %c0_i32_1 = arith.constant 0 : i32
    return %arg0, %c0_i32, %c0_i32_0 : i32, i32, i32
  }
}

module attributes {stable_mosaic.version = 11 : i64} {
  func.func @kernel(%arg0: memref<2x2x384xf32, #tpu.memory_space<vmem>>, %arg1: memref<2x2x384xf32, #tpu.memory_space<vmem>>, %arg2: memref<2x2x384xf32, #tpu.memory_space<vmem>>, %arg3: memref<4xf32, #tpu.memory_space<smem>>) attributes {dimension_semantics = [], scalar_prefetch = 0 : i64, scratch_operands = 0 : i64, tpu.core_type = #tpu.core_type<tc>} {
    %c0 = arith.constant 0 : index
    %c0_0 = arith.constant 0 : index
    %c0_1 = arith.constant 0 : index
    %0 = vector.load %arg0[%c0, %c0_0, %c0_1] : memref<2x2x384xf32, #tpu.memory_space<vmem>>, vector<1x2x384xf32>
    %1 = vector.shape_cast %0 : vector<1x2x384xf32> to vector<2x384xf32>
    %c0_2 = arith.constant 0 : index
    %c0_3 = arith.constant 0 : index
    %c0_4 = arith.constant 0 : index
    %2 = vector.load %arg1[%c0_2, %c0_3, %c0_4] : memref<2x2x384xf32, #tpu.memory_space<vmem>>, vector<1x2x384xf32>
    %3 = vector.shape_cast %2 : vector<1x2x384xf32> to vector<2x384xf32>
    %c0_5 = arith.constant 0 : index
    %c0_6 = arith.constant 0 : index
    %c0_7 = arith.constant 0 : index
    %4 = vector.load %arg2[%c0_5, %c0_6, %c0_7] : memref<2x2x384xf32, #tpu.memory_space<vmem>>, vector<1x2x384xf32>
    %5 = vector.shape_cast %4 : vector<1x2x384xf32> to vector<2x384xf32>
    %c1 = arith.constant 1 : index
    %c0_8 = arith.constant 0 : index
    %c0_9 = arith.constant 0 : index
    %6 = vector.load %arg0[%c1, %c0_8, %c0_9] : memref<2x2x384xf32, #tpu.memory_space<vmem>>, vector<1x2x384xf32>
    %7 = vector.shape_cast %6 : vector<1x2x384xf32> to vector<2x384xf32>
    %8 = arith.addf %1, %7 : vector<2x384xf32>
    %c1_10 = arith.constant 1 : index
    %c0_11 = arith.constant 0 : index
    %c0_12 = arith.constant 0 : index
    %9 = vector.load %arg1[%c1_10, %c0_11, %c0_12] : memref<2x2x384xf32, #tpu.memory_space<vmem>>, vector<1x2x384xf32>
    %10 = vector.shape_cast %9 : vector<1x2x384xf32> to vector<2x384xf32>
    %11 = arith.addf %3, %10 : vector<2x384xf32>
    %c1_13 = arith.constant 1 : index
    %c0_14 = arith.constant 0 : index
    %c0_15 = arith.constant 0 : index
    %12 = vector.load %arg2[%c1_13, %c0_14, %c0_15] : memref<2x2x384xf32, #tpu.memory_space<vmem>>, vector<1x2x384xf32>
    %13 = vector.shape_cast %12 : vector<1x2x384xf32> to vector<2x384xf32>
    %14 = arith.addf %5, %13 : vector<2x384xf32>
    %15 = vector.extract_strided_slice %8 {offsets = [0, 0], sizes = [2, 128], strides = [1, 1]} : vector<2x384xf32> to vector<2x128xf32>
    %16 = vector.extract_strided_slice %11 {offsets = [0, 0], sizes = [2, 128], strides = [1, 1]} : vector<2x384xf32> to vector<2x128xf32>
    %17 = arith.mulf %15, %16 : vector<2x128xf32>
    %cst = arith.constant dense<0.000000e+00> : vector<2xf32>
    %18 = vector.multi_reduction <add>, %17, %cst [1] : vector<2x128xf32> to vector<2xf32>
    %19 = vector.shape_cast %18 : vector<2xf32> to vector<2x1xf32>
    %20 = arith.mulf %15, %15 : vector<2x128xf32>
    %cst_16 = arith.constant dense<0.000000e+00> : vector<2xf32>
    %21 = vector.multi_reduction <add>, %20, %cst_16 [1] : vector<2x128xf32> to vector<2xf32>
    %22 = vector.shape_cast %21 : vector<2xf32> to vector<2x1xf32>
    %23 = math.sqrt %22 : vector<2x1xf32>
    %24 = arith.mulf %16, %16 : vector<2x128xf32>
    %cst_17 = arith.constant dense<0.000000e+00> : vector<2xf32>
    %25 = vector.multi_reduction <add>, %24, %cst_17 [1] : vector<2x128xf32> to vector<2xf32>
    %26 = vector.shape_cast %25 : vector<2xf32> to vector<2x1xf32>
    %27 = math.sqrt %26 : vector<2x1xf32>
    %28 = arith.mulf %23, %27 : vector<2x1xf32>
    %cst_18 = arith.constant 9.99999993E-9 : f32
    %29 = vector.broadcast %cst_18 : f32 to vector<2x1xf32>
    %30 = arith.maximumf %28, %29 : vector<2x1xf32>
    %31 = arith.divf %19, %30 : vector<2x1xf32>
    %cst_19 = arith.constant 1.000000e+00 : f32
    %32 = vector.broadcast %cst_19 : f32 to vector<2x1xf32>
    %33 = arith.subf %32, %31 : vector<2x1xf32>
    %34 = vector.shape_cast %33 : vector<2x1xf32> to vector<1x2x1xf32>
    %cst_20 = arith.constant dense<0.000000e+00> : vector<1xf32>
    %35 = vector.multi_reduction <add>, %34, %cst_20 [1, 2] : vector<1x2x1xf32> to vector<1xf32>
    %36 = vector.shape_cast %35 : vector<1xf32> to vector<1x1x1xf32>
    %37 = vector.extract %36[0, 0, 0] : f32 from vector<1x1x1xf32>
    %cst_21 = arith.constant 2.000000e+00 : f32
    %38 = arith.divf %37, %cst_21 : f32
    %cst_22 = arith.constant 1.000000e+01 : f32
    %39 = arith.mulf %38, %cst_22 : f32
    %40 = vector.extract_strided_slice %8 {offsets = [0, 128], sizes = [2, 128], strides = [1, 1]} : vector<2x384xf32> to vector<2x128xf32>
    %41 = vector.extract_strided_slice %11 {offsets = [0, 128], sizes = [2, 128], strides = [1, 1]} : vector<2x384xf32> to vector<2x128xf32>
    %42 = arith.subf %40, %41 : vector<2x128xf32>
    %43 = arith.mulf %42, %42 : vector<2x128xf32>
    %cst_23 = arith.constant dense<0.000000e+00> : vector<2xf32>
    %44 = vector.multi_reduction <add>, %43, %cst_23 [1] : vector<2x128xf32> to vector<2xf32>
    %45 = vector.shape_cast %44 : vector<2xf32> to vector<2x1xf32>
    %46 = math.sqrt %45 : vector<2x1xf32>
    %47 = vector.shape_cast %46 : vector<2x1xf32> to vector<1x2x1xf32>
    %cst_24 = arith.constant dense<0.000000e+00> : vector<1xf32>
    %48 = vector.multi_reduction <add>, %47, %cst_24 [1, 2] : vector<1x2x1xf32> to vector<1xf32>
    %49 = vector.shape_cast %48 : vector<1xf32> to vector<1x1x1xf32>
    %50 = vector.extract %49[0, 0, 0] : f32 from vector<1x1x1xf32>
    %cst_25 = arith.constant 2.000000e+00 : f32
    %51 = arith.divf %50, %cst_25 : f32
    %cst_26 = arith.constant 1.000000e+00 : f32
    %52 = arith.mulf %51, %cst_26 : f32
    %53 = vector.extract_strided_slice %8 {offsets = [0, 256], sizes = [2, 128], strides = [1, 1]} : vector<2x384xf32> to vector<2x128xf32>
    %54 = vector.extract_strided_slice %14 {offsets = [0, 256], sizes = [2, 128], strides = [1, 1]} : vector<2x384xf32> to vector<2x128xf32>
    %55 = arith.subf %53, %54 : vector<2x128xf32>
    %56 = arith.mulf %55, %55 : vector<2x128xf32>
    %cst_27 = arith.constant dense<0.000000e+00> : vector<2xf32>
    %57 = vector.multi_reduction <add>, %56, %cst_27 [1] : vector<2x128xf32> to vector<2xf32>
    %58 = vector.shape_cast %57 : vector<2xf32> to vector<2x1xf32>
    %59 = math.sqrt %58 : vector<2x1xf32>
    %60 = vector.shape_cast %59 : vector<2x1xf32> to vector<1x2x1xf32>
    %cst_28 = arith.constant dense<0.000000e+00> : vector<1xf32>
    %61 = vector.multi_reduction <add>, %60, %cst_28 [1, 2] : vector<1x2x1xf32> to vector<1xf32>
    %62 = vector.shape_cast %61 : vector<1xf32> to vector<1x1x1xf32>
    %63 = vector.extract %62[0, 0, 0] : f32 from vector<1x1x1xf32>
    %cst_29 = arith.constant 2.000000e+00 : f32
    %64 = arith.divf %63, %cst_29 : f32
    %cst_30 = arith.constant 5.000000e+00 : f32
    %65 = arith.mulf %64, %cst_30 : f32
    %66 = arith.addf %39, %52 : f32
    %67 = arith.addf %66, %65 : f32
    %c0_31 = arith.constant 0 : index
    %68 = memref.load %arg3[%c0_31] : memref<4xf32, #tpu.memory_space<smem>>
    memref.store %67, %arg3[%c0_31] : memref<4xf32, #tpu.memory_space<smem>>
    %c1_32 = arith.constant 1 : index
    %69 = memref.load %arg3[%c1_32] : memref<4xf32, #tpu.memory_space<smem>>
    memref.store %39, %arg3[%c1_32] : memref<4xf32, #tpu.memory_space<smem>>
    %c2 = arith.constant 2 : index
    %70 = memref.load %arg3[%c2] : memref<4xf32, #tpu.memory_space<smem>>
    memref.store %52, %arg3[%c2] : memref<4xf32, #tpu.memory_space<smem>>
    %c3 = arith.constant 3 : index
    %71 = memref.load %arg3[%c3] : memref<4xf32, #tpu.memory_space<smem>>
    memref.store %65, %arg3[%c3] : memref<4xf32, #tpu.memory_space<smem>>
    return
  }
}

</mosaic_0001>

<bundles_post_ra>
// kernel: loss_fn.3
= control target key start
LH: loop header
LB: loop body
LE: loop exit
PB: predicated region body
PF: predicated region fallthrough
CT: control target
= control target key end

     0   :  { %vm28_vm0 = vcmask 1041408   ;;  %s302_s0 = inlined_call_operand.vmem [shape: f32[2,2,384], index: 0, kind: input, shape index: {}]   ;;  %s303_s1 = inlined_call_operand.vmem [shape: f32[2,2,384], index: 1, kind: input, shape index: {}]   ;;  %s304_s2 = inlined_call_operand.vmem [shape: f32[2,2,384], index: 2, kind: input, shape index: {}]   ;;  %s305_s3 = inlined_call_operand.vmem [shape: f32[4], index: 3, kind: output, shape index: {}]  }
   0x1   :  { %v15_v0 = vld [vmem:[%s302_s0] sm:$0x3f]  ;;  %v212_v1 = vld [vmem:[%s302_s0 + $0x6] sm:$0x3f] }
   0x2   :  { %v20_v2 = vadd.f32 %v212_v1, %v15_v0  ;;  %v16_v3 = vld [vmem:[%s303_s1] sm:$0x3f]  ;;  %v213_v4 = vld [vmem:[%s303_s1 + $0x6] sm:$0x3f] }
   0x3   :  { %v17_v5 = vld [vmem:[%s304_s2] sm:$0x3f]  ;;  %v23_v6 = vadd.f32 %v213_v4, %v16_v3  ;;  %v214_v7 = vld [vmem:[%s304_s2 + $0x6] sm:$0x3f] }
   0x4   :  { %8 = vsyncpa [#allocation3], 0  ;;  %v32_v8 = vmul.f32 %v20_v2, %v20_v2  ;;  %v104_v9 = vrot.slane %v20_v2, 2  ;;  %v26_v10 = vadd.f32 %v214_v7, %v17_v5  ;;  %v145_v12 = vrot.slane %v20_v2, 4  ;;  %s202_s4 = sshll.u32 %s305_s3, 4  ;;  %s252_s8 = smov [#allocation2]   ;;  %s203_s4 = int_to_ptr.vmem [resolvable:$true] %s202_s4 }
   0x5   :  { %v107_v11 = vrot.slane %v23_v6, 2  ;;  %v27_v13 = vmul.f32 %v23_v6, %v20_v2  ;;  %v48_v18 = vmul.f32 %v23_v6, %v23_v6  ;;  %vm82_vm3 = vcmask 1024  }
   0x6   :  { %v33_v14 = vsel %vm28_vm0, %v32_v8, 0.0  ;;  %v148_v15 = vrot.slane %v26_v10, 4 }
   0x7   :  { %34 = vadd.xlane.f32.xlu0 %v33_v14  ;;  %v109_v16 = vsub.f32 %v104_v9, %v107_v11  ;;  %v29_v17 = vsel %vm28_vm0, %v27_v13, 0.0  ;;  %v49_v22 = vsel %vm28_vm0, %v48_v18, 0.0 }
   0x8   :  { %30 = vadd.xlane.f32.xlu2 %v29_v17  ;;  %v150_v20 = vsub.f32 %v145_v12, %v148_v15 }
   0x9   :  { %v110_v19 = vmul.f32 %v109_v16, %v109_v16 }
   0xa   :  { %v151_v23 = vmul.f32 %v150_v20, %v150_v20 }
   0xb   :  { %v111_v21 = vsel %vm28_vm0, %v110_v19, 0.0 }
   0xc   :  { %112 = vadd.xlane.f32.xlu1 %v111_v21  ;;  %v152_v24 = vsel %vm28_vm0, %v151_v23, 0.0  ;;  %v251_v23 = vmov 2.0  }
   0xf   :  { %50 = vadd.xlane.f32.xlu0 %v49_v22 }
  0x14   :  { %153 = vadd.xlane.f32.xlu1 %v152_v24 }
  0x7a   :  { %v35_v25 = vpop.xlane.xlu0 %34 }
  0x7b   :  { %225 = vrsqrt.f32 %v35_v25  ;;  %vm43_vm4 = vcmp.eq.f32.partialorder %v35_v25, inf  ;;  %v46_v56 = vand.u32 2147483648, %v35_v25  ;;  %vm45_vm6 = vcmp.eq.f32.partialorder %v35_v25, 0.0  ;;  %v31_v17 = vpop.xlane.xlu2 %30 }
  0x7f   :  { %v113_v26 = vpop.xlane.xlu1 %112 }
  0x80   :  { %227 = vrsqrt.f32 %v113_v26  ;;  %vm121_vm1 = vcmp.eq.f32.partialorder %v113_v26, inf  ;;  %v124_v49 = vand.u32 2147483648, %v113_v26  ;;  %vm123_vm2 = vcmp.eq.f32.partialorder %v113_v26, 0.0 }
  0x81   :  { %v226_v27 = vpop.eup %225 }
  0x82   :  { %v37_v28 = vmul.f32 %v226_v27, %v35_v25  ;;  %v51_v29 = vpop.xlane.xlu0 %50 }
  0x83   :  { %229 = vrsqrt.f32 %v51_v29  ;;  %vm59_vm5 = vcmp.eq.f32.partialorder %v51_v29, inf  ;;  %v62_v59 = vand.u32 2147483648, %v51_v29  ;;  %vm61_vm7 = vcmp.eq.f32.partialorder %v51_v29, 0.0 }
  0x84   :  { %v38_v30 = vmul.f32 %v226_v27, %v37_v28 }
  0x86   :  { %v228_v31 = vpop.eup %227  ;;  %v39_v32 = vmul.f32 0.5, %v38_v30 }
  0x87   :  { %v154_v33 = vpop.xlane.xlu1 %153  ;;  %v115_v34 = vmul.f32 %v228_v31, %v113_v26 }
  0x88   :  { %v40_v35 = vsub.f32 1.5, %v39_v32  ;;  %231 = vrsqrt.f32 %v154_v33  ;;  %vm162_vm8 = vcmp.eq.f32.partialorder %v154_v33, inf  ;;  %v165_v2 = vand.u32 2147483648, %v154_v33 }
  0x89   :  { %v230_v36 = vpop.eup %229  ;;  %v116_v37 = vmul.f32 %v228_v31, %v115_v34  ;;  %vm164_vm9 = vcmp.eq.f32.partialorder %v154_v33, 0.0 }
  0x8a   :  { %v53_v38 = vmul.f32 %v230_v36, %v51_v29  ;;  %v41_v40 = vmul.f32 %v226_v27, %v40_v35 }
  0x8b   :  { %v117_v39 = vmul.f32 0.5, %v116_v37 }
  0x8c   :  { %v54_v41 = vmul.f32 %v230_v36, %v53_v38  ;;  %v42_v47 = vmul.f32 %v41_v40, %v35_v25 }
  0x8d   :  { %v118_v42 = vsub.f32 1.5, %v117_v39 }
  0x8e   :  { %v232_v43 = vpop.eup %231  ;;  %v55_v44 = vmul.f32 0.5, %v54_v41  ;;  %v44_v55 = vsel %vm43_vm4, %v35_v25, %v42_v47 }
  0x8f   :  { %v119_v45 = vmul.f32 %v228_v31, %v118_v42  ;;  %v156_v46 = vmul.f32 %v232_v43, %v154_v33  ;;  %v47_v63 = vsel %vm45_vm6, %v46_v56, %v44_v55 }
  0x90   :  { %v56_v48 = vsub.f32 1.5, %v55_v44 }
  0x91   :  { %v120_v50 = vmul.f32 %v119_v45, %v113_v26  ;;  %v157_v51 = vmul.f32 %v232_v43, %v156_v46 }
  0x92   :  { %v57_v52 = vmul.f32 %v230_v36, %v56_v48 }
  0x93   :  { %v122_v53 = vsel %vm121_vm1, %v113_v26, %v120_v50  ;;  %v158_v54 = vmul.f32 0.5, %v157_v51 }
  0x94   :  { %v58_v57 = vmul.f32 %v57_v52, %v51_v29  ;;  %v125_v58 = vsel %vm123_vm2, %v124_v49, %v122_v53 }
  0x95   :  { %v126_v60 = vsel %vm82_vm3, %v125_v58, 0.0  ;;  %v159_v61 = vsub.f32 1.5, %v158_v54 }
  0x96   :  { %v60_v62 = vsel %vm59_vm5, %v51_v29, %v58_v57  ;;  %127 = vadd.xlane.f32.xlu0 %v126_v60 }
  0x97   :  { %v63_v0 = vsel %vm61_vm7, %v62_v59, %v60_v62  ;;  %v160_v1 = vmul.f32 %v232_v43, %v159_v61 }
  0x98   :  { %v64_v3 = vmul.f32 %v63_v0, %v47_v63 }
  0x99   :  { %v161_v4 = vmul.f32 %v160_v1, %v154_v33 }
  0x9a   :  { %v65_v5 = vmax.f32 %v64_v3, 1e-08 }
  0x9b   :  { %v163_v6 = vsel %vm162_vm8, %v154_v33, %v161_v4 }
  0x9c   :  { %v166_v7 = vsel %vm164_vm9, %v165_v2, %v163_v6  ;;  %233 = vrcp.f32 %v65_v5  ;;  %v77_v12 = vand.u32 2147483648, %v65_v5  ;;  %v75_v14 = vand.u32 2147483647, %v65_v5 }
  0x9d   :  { %v167_v8 = vsel %vm82_vm3, %v166_v7, 0.0  ;;  %vm71_vm11 = vweird.f32 %v65_v5  ;;  %235 = vrcp.f32 %v251_v23 }
  0x9e   :  { %168 = vadd.xlane.f32.xlu1 %v167_v8  ;;  %v78_v16 = vor.u32 1.1754944e-38, %v77_v12  ;;  %vm76_vm13 = vcmp.eq.f32.partialorder %v75_v14, 8.507059e+37 }
  0xa2   :  { %v234_v9 = vpop.eup %233 }
  0xa3   :  { %v67_v10 = vmul.f32 %v234_v9, %v65_v5  ;;  %vm72_vm10 = vweird.f32 %v234_v9  ;;  %v236_v26 = vpop.eup %235 }
  0xa4   :  { %vm73_vm12 = vmor %vm71_vm11, %vm72_vm10  ;;  %v94_v29 = vmul.f32 2.0, %v236_v26  ;;  %vm98_vm14 = vweird.f32 %v236_v26 }
  0xa5   :  { %v68_v11 = vsub.f32 1.0, %v67_v10 }
  0xa6   :  { %v95_v32 = vsub.f32 1.0, %v94_v29 }
  0xa7   :  { %v69_v13 = vmul.f32 %v234_v9, %v68_v11 }
  0xa8   :  { %v96_v38 = vmul.f32 %v236_v26, %v95_v32 }
  0xa9   :  { %v70_v15 = vadd.f32 %v234_v9, %v69_v13 }
  0xaa   :  { %v97_v43 = vadd.f32 %v236_v26, %v96_v38 }
  0xab   :  { %v74_v18 = vsel %vm73_vm12, %v234_v9, %v70_v15 }
  0xac   :  { %v79_v19 = vsel %vm76_vm13, %v78_v16, %v74_v18  ;;  %v99_v48 = vsel %vm98_vm14, %v236_v26, %v97_v43 }
  0xad   :  { %v80_v20 = vmul.f32 %v79_v19, %v31_v17 }
  0xaf   :  { %v81_v21 = vsub.f32 1.0, %v80_v20 }
  0xb1   :  { %v83_v22 = vsel %vm82_vm3, %v81_v21, 0.0 }
  0xb2   :  { %84 = vadd.xlane.f32.xlu2 %v83_v22 }
 0x109   :  { %v128_v24 = vpop.xlane.xlu0 %127 }
 0x10a   :  { %v129_v27 = vrot.slane %v128_v24, 4 }
 0x10c   :  { %v130_v30 = vadd.f32 %v129_v27, %v128_v24 }
 0x10e   :  { %v131_v34 = vrot.slane %v130_v30, 2 }
 0x110   :  { %v132_v39 = vadd.f32 %v131_v34, %v130_v30 }
 0x111   :  { %v169_v25 = vpop.xlane.xlu1 %168 }
 0x112   :  { %v170_v28 = vrot.slane %v169_v25, 4  ;;  %v133_v45 = vrot.slane %v132_v39, 1 }
 0x114   :  { %v171_v31 = vadd.f32 %v170_v28, %v169_v25  ;;  %v134_v49 = vadd.f32 %v133_v45, %v132_v39 }
 0x116   :  { %v172_v36 = vrot.slane %v171_v31, 2 }
 0x118   :  { %v173_v41 = vadd.f32 %v172_v36, %v171_v31 }
 0x11a   :  { %v174_v46 = vrot.slane %v173_v41, 1 }
 0x11c   :  { %v175_v50 = vadd.f32 %v174_v46, %v173_v41 }
 0x125   :  { %v85_v33 = vpop.xlane.xlu2 %84 }
 0x126   :  { %v86_v35 = vrot.slane %v85_v33, 4 }
 0x128   :  { %v87_v37 = vadd.f32 %v86_v35, %v85_v33 }
 0x12a   :  { %v88_v40 = vrot.slane %v87_v37, 2 }
 0x12c   :  { %v89_v42 = vadd.f32 %v88_v40, %v87_v37 }
 0x12e   :  { %v90_v44 = vrot.slane %v89_v42, 1 }
 0x130   :  { %v91_v47 = vadd.f32 %v90_v44, %v89_v42 }
 0x132   :  { %215 = vpush %v91_v47 }
 0x133   :  { %217 = vpush %v99_v48 }
 0x134   :  { %219 = vpush %v134_v49 }
 0x135   :  { %221 = vpush %v175_v50 }
 0x163   :  { %s216_s0 = spop %215 }
 0x164   :  { %s218_s1 = spop %217 }
 0x165   :  { %s101_s2 = smul.f32 %s218_s1, %s216_s0  ;;  %s220_s24 = spop %219 }
 0x166   :  { %s144_s25 = smul.f32 %s220_s24, %s218_s1  ;;  %s222_s26 = spop %221 }
 0x167   :  { %s102_s27 = smul.f32 10.0, %s101_s2 }
 0x168   :  { %194 = sst [smem:[#allocation2 + $0x2]] %s144_s25  ;;  %s185_s28 = smul.f32 %s222_s26, %s218_s1 }
 0x169   :  { %192 = sst [smem:[#allocation2 + $0x1]] %s102_s27 }
 0x16a   :  { %s187_s5 = sadd.f32 %s144_s25, %s102_s27  ;;  %s186_s6 = smul.f32 5.0, %s185_s28 }
 0x16c   :  { %s188_s7 = sadd.f32 %s187_s5, %s186_s6 }
 0x16d   :  { %196 = sst [smem:[#allocation2 + $0x3]] %s186_s6 }
 0x16e   :  { %190 = sst [smem:[#allocation2]] %s188_s7 }
 0x16f   :  { %205 = dma.smem_to_vmem %s252_s8, 16, %s203_s4, [#allocation3]  }
 0x170   :  { %249 = dma.done.wait [#allocation3], 16  }
 0x171   :  { %250 = vsyncadd [#allocation3], 4294967280 }
 0x172   :  { %210 = sfence }
 0x173   :  { %211 = vsyncpa [#allocation3], 1 }

// kernel: loss_fn.2
= control target key start
LH: loop header
LB: loop body
LE: loop exit
PB: predicated region body
PF: predicated region fallthrough
CT: control target
= control target key end

     0   :  { %12 = vsyncpa [#allocation6], 0  ;;  %s2698_s0 = inlined_call_operand.vmem [shape: bf16[2,768], index: 0, kind: input, shape index: {}]   ;;  %s2699_s1 = inlined_call_operand.vmem [shape: bf16[2,768], index: 1, kind: input, shape index: {}]   ;;  %s2700_s2 = inlined_call_operand.vmem [shape: bf16[2,768], index: 2, kind: input, shape index: {}]   ;;  %s2701_s3 = inlined_call_operand.hbm [shape: bf16[768,384], index: 3, kind: input, shape index: {}]   ;;  %s2702_s4 = inlined_call_operand.vmem [shape: f32[2,2,384], index: 4, kind: output, shape index: {0}]   ;;  %s2703_s5 = inlined_call_operand.vmem [shape: f32[2,2,384], index: 5, kind: output, shape index: {1}]   ;;  %s2704_s6 = inlined_call_operand.vmem [shape: f32[2,2,384], index: 6, kind: output, shape index: {2}]  }
   0x1   :  { %14 = vsyncpa [#allocation6 + $0x1], 0  ;;  %s2027_s21 = smov 0   ;;  %s2029_s22 = smov 0  }
   0x2   :  { %s2031_s23 = smov 0   ;;  %s2033_s24 = smov 0  }
   0x3   :  { %s2035_s25 = smov 0   ;;  %s2037_s26 = smov 0  }
   0x4 LB: > { %s1473_s27 = sadd.s32 4294967295, %s1987_s26   ;;  %s32_s28 = sadd.s32 1, %s1983_s25  ;;  %s1987_s26 = sphi %s2037_s26, %s20_s26   ;;  %s1983_s25 = sphi %s2035_s25, %s2795_s25   ;;  %s1979_s24 = sphi %s2033_s24, %s2794_s24   ;;  %s1975_s23 = sphi %s2031_s23, %s2793_s23   ;;  %s1971_s22 = sphi %s2029_s22, %s2792_s22   ;;  %s1967_s21 = sphi %s2027_s21, %s2791_s21  }
   0x5   : > { %p34_p0 = scmp.ge.s32.totalorder %s32_s28, 2  ;;  %s125_s29 = sadd.s32 1, %s1975_s23 }
   0x6   : > { %p132_p1 = scmp.ne.s32.totalorder %s1975_s23, %s1971_s22  ;;  %p133_p2 = scmp.eq.s32.totalorder %s1987_s26, 0 }
   0x7   : > { %s2797_s28 = smov (%p34_p0, %s32_s28), 0  ;;  %p138_p4 = scmp.ne.s32.totalorder %s1971_s22, %s1967_s21 }
   0x8   : > { %p134_p3 = por %p133_p2, %p132_p1  ;;  %s122_s30 = ssub.s32 %s1983_s25, %s2797_s28 }
   0x9   : > { %p139_p5 = scmp.eq.s32.totalorder %s1473_s27, 0  ;;  %p123_p6 = scmp.eq.s32.totalorder %s122_s30, 0 }
   0xa   : > { %p1854_p8 = scmp.lt.s32.totalorder %s1987_s26, 2  ;;  %s270_s9 = sand.u32 1, %s1975_s23  }
   0xb   : > { %p2066_p7 = por %p139_p5, %p138_p4  ;;  %s1844_s10 = smul.u32 576, %s270_s9 }
   0xc   : > { %s2072_s8 = scalar_select %p123_p6, %s1975_s23, %s125_s29  }
   0xd   : > { %s1855_s11 = smul.u32 576, %s1983_s25  ;;  %p1851_p9 = pnand %p1854_p8, %p134_p3 }
   0xe   : > { %s274_s15 = scalar_lea.vmem [#allocation5], %s1844_s10  ;;  %p1478_p10 = scmp.ge.s32.totalorder %s1987_s26, 1 }
   0xf   : > { %s281_s14 = scalar_lea.hbm %s2701_s3, %s1855_s11  ;;  %s284_s16 = sshll.u32 %s274_s15, 4  ;;  %s285_s16 = int_to_ptr.vmem [resolvable:$true] %s284_s16 }
  0x10   : > { %s282_s17 = sshll.u32 %s281_s14, 4  ;;  %s271_s18 = scalar_lea.sflag [#allocation6], %s270_s9  ;;  %s283_s17 = int_to_ptr.hbm [resolvable:$true] %s282_s17 }
  0x11   : > { %s1989_s19 = smov 192   ;;  %s1990_s20 = smov 12  }
  0x12   : > { %1853 = dma.hbm_to_vmem [thread:$0]  (!%p1851_p9), %s283_s17, 9216, %s285_s16, %s271_s18, %s1989_s19, %s1989_s19, %s1990_s20  }
  0x13   : > { %p292_p11 = scmp.lt.s32.totalorder %s1987_s26, 3 }
  0x15   : > { %p293_p12 = pnand %p1478_p10, %p292_p11 }
  0x17   : > { %296 = sbr.rel (%p293_p12) target bundleno = 409 (0x199), region = 36 }
  0x1c   : > { %s298_s21 = sand.u32 1, %s1971_s22  }
  0x1d   : > { %s1846_s27 = smul.u32 576, %s298_s21  ;;  %s299_s29 = scalar_lea.sflag [#allocation6], %s298_s21 }
  0x1f   : > { %s2082_s30 = scalar_lea.vmem [#allocation5], %s1846_s27 }
  0x20   : > { %1962 = dma.done.wait (%p2066_p7), %s299_s29, 9216  }
  0x21   : > { %1964 = vsyncadd (%p2066_p7), %s299_s29, 4294958080  ;;  %v1568_v0 = vld [vmem:[%s2082_s30 + $0xa8] sm:$0xf]  ;;  %v1794_v1 = vld [vmem:[%s2082_s30 + $0xb0] sm:$0xf0]  ;;  %s358_s7 = smul.u32 3, %s1979_s24 }
  0x22   : > { %v1664_v2 = vld [vmem:[%s2082_s30 + $0x168] sm:$0xf]  ;;  %v2091_v3 = vor.u32 %v1794_v1, %v1568_v0  ;;  %v1818_v4 = vld [vmem:[%s2082_s30 + $0x170] sm:$0xf0]  ;;  %v1793_v9 = vld [vmem:[%s2082_s30 + $0xac] sm:$0xf] }
  0x23   : > { %v1760_v5 = vld [vmem:[%s2082_s30 + $0x228] sm:$0xf]  ;;  %v1842_v6 = vld [vmem:[%s2082_s30 + $0x230] sm:$0xf0]  ;;  %v2096_v7 = vor.u32 %v1818_v4, %v1664_v2  ;;  %v1570_v10 = vld [vmem:[%s2082_s30 + $0xb4] sm:$0xf0] }
  0x24   : > { %v2098_v8 = vor.u32 %v1842_v6, %v1760_v5  ;;  %v1556_v11 = vld [vmem:[%s2082_s30 + $0x90] sm:$0xf]  ;;  %892 = vmatpush.bf16.msra.mxu0 %v2091_v3  ;;  %v2104_v12 = vor.u32 %v1793_v9, %v1570_v10  ;;  %v1791_v13 = vld [vmem:[%s2082_s30 + $0x98] sm:$0xf0]  ;;  %v1790_v20 = vld [vmem:[%s2082_s30 + $0x94] sm:$0xf] }
  0x25   : > { %v1652_v14 = vld [vmem:[%s2082_s30 + $0x150] sm:$0xf]  ;;  %v1815_v15 = vld [vmem:[%s2082_s30 + $0x158] sm:$0xf0]  ;;  %905 = vmatpush.bf16.msra.mxu1 %v2096_v7  ;;  %v2111_v16 = vor.u32 %v1791_v13, %v1556_v11  ;;  %v1558_v22 = vld [vmem:[%s2082_s30 + $0x9c] sm:$0xf0] }
  0x26   : > { %918 = vmatpush.bf16.msra.mxu2 %v2098_v8  ;;  %v2113_v17 = vor.u32 %v1815_v15, %v1652_v14  ;;  %v1748_v18 = vld [vmem:[%s2082_s30 + $0x210] sm:$0xf]  ;;  %v1839_v19 = vld [vmem:[%s2082_s30 + $0x218] sm:$0xf0]  ;;  %931 = vmatpush.bf16.msra.mxu3 %v2104_v12  ;;  %v1544_v23 = vld [vmem:[%s2082_s30 + $0x78] sm:$0xf]  ;;  %v2124_v25 = vor.u32 %v1790_v20, %v1558_v22 }
  0x27   : > { %v2119_v21 = vor.u32 %v1839_v19, %v1748_v18  ;;  %v1788_v24 = vld [vmem:[%s2082_s30 + $0x80] sm:$0xf0]  ;;  %v1640_v26 = vld [vmem:[%s2082_s30 + $0x138] sm:$0xf]  ;;  %v1787_v31 = vld [vmem:[%s2082_s30 + $0x7c] sm:$0xf] }
  0x28   : > { %v1812_v27 = vld [vmem:[%s2082_s30 + $0x140] sm:$0xf0]  ;;  %v1736_v28 = vld [vmem:[%s2082_s30 + $0x1f8] sm:$0xf]  ;;  %893 = vmatpush.bf16.msra.mxu0 %v2111_v16  ;;  %v2130_v29 = vor.u32 %v1788_v24, %v1544_v23  ;;  %v1546_v32 = vld [vmem:[%s2082_s30 + $0x84] sm:$0xf0] }
  0x29   : > { %v1836_v30 = vld [vmem:[%s2082_s30 + $0x200] sm:$0xf0]  ;;  %906 = vmatpush.bf16.msra.mxu1 %v2113_v17  ;;  %v2137_v33 = vor.u32 %v1812_v27, %v1640_v26  ;;  %v1532_v35 = vld [vmem:[%s2082_s30 + $0x60] sm:$0xf]  ;;  %v1785_v36 = vld [vmem:[%s2082_s30 + $0x68] sm:$0xf0]  ;;  %v2145_v38 = vor.u32 %v1787_v31, %v1546_v32 }
  0x2a   : > { %919 = vmatpush.bf16.msra.mxu2 %v2119_v21  ;;  %v2139_v34 = vor.u32 %v1836_v30, %v1736_v28  ;;  %v1628_v37 = vld [vmem:[%s2082_s30 + $0x120] sm:$0xf]  ;;  %932 = vmatpush.bf16.msra.mxu3 %v2124_v25  ;;  %v1809_v39 = vld [vmem:[%s2082_s30 + $0x128] sm:$0xf0]  ;;  %v1784_v42 = vld [vmem:[%s2082_s30 + $0x64] sm:$0xf]  ;;  %v2153_v44 = vor.u32 %v1785_v36, %v1532_v35 }
  0x2b   : > { %v1724_v40 = vld [vmem:[%s2082_s30 + $0x1e0] sm:$0xf]  ;;  %v1833_v41 = vld [vmem:[%s2082_s30 + $0x1e8] sm:$0xf0]  ;;  %v1534_v43 = vld [vmem:[%s2082_s30 + $0x6c] sm:$0xf0]  ;;  %v2157_v45 = vor.u32 %v1809_v39, %v1628_v37 }
  0x2c   : > { %894 = vmatpush.bf16.msra.mxu0 %v2130_v29  ;;  %v2159_v46 = vor.u32 %v1833_v41, %v1724_v40  ;;  %v1520_v47 = vld [vmem:[%s2082_s30 + $0x48] sm:$0xf]  ;;  %v1782_v48 = vld [vmem:[%s2082_s30 + $0x50] sm:$0xf0]  ;;  %v2165_v50 = vor.u32 %v1784_v42, %v1534_v43  ;;  %v1781_v54 = vld [vmem:[%s2082_s30 + $0x4c] sm:$0xf] }
  0x2d   : > { %907 = vmatpush.bf16.msra.mxu1 %v2137_v33  ;;  %v1616_v49 = vld [vmem:[%s2082_s30 + $0x108] sm:$0xf]  ;;  %v1806_v51 = vld [vmem:[%s2082_s30 + $0x110] sm:$0xf0]  ;;  %v1522_v55 = vld [vmem:[%s2082_s30 + $0x54] sm:$0xf0]  ;;  %v2173_v56 = vor.u32 %v1782_v48, %v1520_v47 }
  0x2e   : > { %920 = vmatpush.bf16.msra.mxu2 %v2139_v34  ;;  %933 = vmatpush.bf16.msra.mxu3 %v2145_v38  ;;  %v1712_v52 = vld [vmem:[%s2082_s30 + $0x1c8] sm:$0xf]  ;;  %v1830_v53 = vld [vmem:[%s2082_s30 + $0x1d0] sm:$0xf0]  ;;  %v2178_v57 = vor.u32 %v1806_v51, %v1616_v49  ;;  %v1508_v59 = vld [vmem:[%s2082_s30 + $0x30] sm:$0xf]  ;;  %v2186_v62 = vor.u32 %v1781_v54, %v1522_v55 }
  0x2f   : > { %v2180_v58 = vor.u32 %v1830_v53, %v1712_v52  ;;  %v1779_v60 = vld [vmem:[%s2082_s30 + $0x38] sm:$0xf0]  ;;  %v1604_v61 = vld [vmem:[%s2082_s30 + $0xf0] sm:$0xf]  ;;  %v1778_v2 = vld [vmem:[%s2082_s30 + $0x34] sm:$0xf] }
  0x30   : > { %895 = vmatpush.bf16.msra.mxu0 %v2153_v44  ;;  %v1803_v63 = vld [vmem:[%s2082_s30 + $0xf8] sm:$0xf0]  ;;  %v1700_v0 = vld [vmem:[%s2082_s30 + $0x1b0] sm:$0xf]  ;;  %v1510_v4 = vld [vmem:[%s2082_s30 + $0x3c] sm:$0xf0]  ;;  %v2194_v5 = vor.u32 %v1779_v60, %v1508_v59 }
  0x31   : > { %908 = vmatpush.bf16.msra.mxu1 %v2157_v45  ;;  %v1827_v1 = vld [vmem:[%s2082_s30 + $0x1b8] sm:$0xf0]  ;;  %p2198_p13 = scmp.lt.s32.totalorder %s358_s7, 5  ;;  %v2204_v6 = vor.u32 %v1803_v63, %v1604_v61  ;;  %v1496_v10 = vld [vmem:[%s2082_s30 + $0x18] sm:$0xf]  ;;  %v2212_v14 = vor.u32 %v1778_v2, %v1510_v4  ;;  %vm1014_vm0 = vcmask 1041408  }
  0x32   : > { %921 = vmatpush.bf16.msra.mxu2 %v2159_v46  ;;  %934 = vmatpush.bf16.msra.mxu3 %v2165_v50  ;;  %v2206_v9 = vor.u32 %v1827_v1, %v1700_v0  ;;  %v1776_v11 = vld [vmem:[%s2082_s30 + $0x20] sm:$0xf0]  ;;  %v1592_v13 = vld [vmem:[%s2082_s30 + $0xd8] sm:$0xf]  ;;  %v1775_v20 = vld [vmem:[%s2082_s30 + $0x1c] sm:$0xf] }
  0x33   : > { %2745 = vst [vmem:[#allocation8_spill] sm:$0xff] %v2212_v14  ;;  %v1800_v15 = vld [vmem:[%s2082_s30 + $0xe0] sm:$0xf0]  ;;  %v1688_v18 = vld [vmem:[%s2082_s30 + $0x198] sm:$0xf]  ;;  %v2220_v23 = vor.u32 %v1776_v11, %v1496_v10  ;;  %s2799_s7 = smov (!%p2198_p13, %s358_s7), 5 }
  0x34   : > { %896 = vmatpush.bf16.msra.mxu0 %v2173_v56  ;;  %v1824_v19 = vld [vmem:[%s2082_s30 + $0x1a0] sm:$0xf0]  ;;  %v1498_v22 = vld [vmem:[%s2082_s30 + $0x24] sm:$0xf0]  ;;  %v1484_v24 = vld [vmem:[%s2082_s30] sm:$0xf]  ;;  %v2232_v27 = vor.u32 %v1800_v15, %v1592_v13  ;;  %s361_s12 = scalar_lea.vmem %s2698_s0, %s2799_s7  ;;  %s368_s15 = scalar_lea.vmem %s2699_s1, %s2799_s7 }
  0x35   : > { %909 = vmatpush.bf16.msra.mxu1 %v2178_v57  ;;  %v1773_v26 = vld [vmem:[%s2082_s30 + $0x8] sm:$0xf0]  ;;  %v2234_v28 = vor.u32 %v1824_v19, %v1688_v18  ;;  %v1580_v30 = vld [vmem:[%s2082_s30 + $0xc0] sm:$0xf]  ;;  %v2240_v35 = vor.u32 %v1775_v20, %v1498_v22  ;;  %v1666_v39 = vld [vmem:[%s2082_s30 + $0x174] sm:$0xf0]  ;;  %s375_s18 = scalar_lea.vmem %s2700_s2, %s2799_s7 }
  0x36   : > { %922 = vmatpush.bf16.msra.mxu2 %v2180_v58  ;;  %935 = vmatpush.bf16.msra.mxu3 %v2186_v62  ;;  %v1797_v31 = vld [vmem:[%s2082_s30 + $0xc8] sm:$0xf0]  ;;  %v1676_v32 = vld [vmem:[%s2082_s30 + $0x180] sm:$0xf]  ;;  %v1762_v41 = vld [vmem:[%s2082_s30 + $0x234] sm:$0xf0]  ;;  %v2249_v43 = vor.u32 %v1773_v26, %v1484_v24 }
  0x37   : > { %2746 = vst [vmem:[#allocation9_spill] sm:$0xff] %v2240_v35  ;;  %v1821_v36 = vld [vmem:[%s2082_s30 + $0x188] sm:$0xf0]  ;;  %v1576_v42 = vld [vmem:[%s2082_s30 + $0xb0] sm:$0xf]  ;;  %v2256_v51 = vor.u32 %v1797_v31, %v1580_v30  ;;  %p380_p0 = scmp.lt.s32.totalorder %s1979_s24, 1 }
  0x38   : > { %897 = vmatpush.bf16.msra.mxu0 %v2194_v5  ;;  %v1817_v37 = vld [vmem:[%s2082_s30 + $0x16c] sm:$0xf]  ;;  %v1795_v47 = vld [vmem:[%s2082_s30 + $0xb8] sm:$0xf0]  ;;  %v1772_v48 = vld [vmem:[%s2082_s30 + $0x4] sm:$0xf]  ;;  %v2258_v52 = vor.u32 %v1821_v36, %v1676_v32 }
  0x39   : > { %910 = vmatpush.bf16.msra.mxu1 %v2204_v6  ;;  %v1841_v40 = vld [vmem:[%s2082_s30 + $0x22c] sm:$0xf]  ;;  %v1486_v49 = vld [vmem:[%s2082_s30 + $0xc] sm:$0xf0]  ;;  %v1819_v54 = vld [vmem:[%s2082_s30 + $0x178] sm:$0xf0]  ;;  %v2263_v55 = vor.u32 %v1817_v37, %v1666_v39  ;;  %v2272_v61 = vor.u32 %v1795_v47, %v1576_v42 }
  0x3a   : > { %923 = vmatpush.bf16.msra.mxu2 %v2206_v9  ;;  %936 = vmatpush.bf16.msra.mxu3 %v2212_v14  ;;  %2747 = vst [vmem:[#allocation10_spill] sm:$0xff] %v2258_v52  ;;  %v1672_v53 = vld [vmem:[%s2082_s30 + $0x170] sm:$0xf]  ;;  %v2265_v59 = vor.u32 %v1841_v40, %v1762_v41  ;;  %v1814_v60 = vld [vmem:[%s2082_s30 + $0x154] sm:$0xf]  ;;  %v2274_v63 = vor.u32 %v1772_v48, %v1486_v49  ;;  %vm1016_vm1 = vcmask 1043456  }
  0x3b   : > { %2748 = vst [vmem:[#allocation11_spill] sm:$0xff] %v2272_v61  ;;  %v1654_v0 = vld [vmem:[%s2082_s30 + $0x15c] sm:$0xf0]  ;;  %v1838_v1 = vld [vmem:[%s2082_s30 + $0x214] sm:$0xf]  ;;  %v2280_v4 = vor.u32 %v1819_v54, %v1672_v53  ;;  %s2801_s24 = smov (!%p380_p0, %s1979_s24), 1 }
  0x3c   : > { %898 = vmatpush.bf16.msra.mxu0 %v2220_v23  ;;  %2749 = vst [vmem:[#allocation12_spill] sm:$0xff] %v2274_v63  ;;  %v1750_v2 = vld [vmem:[%s2082_s30 + $0x21c] sm:$0xf0]  ;;  %v1564_v10 = vld [vmem:[%s2082_s30 + $0x98] sm:$0xf]  ;;  %v2290_v19 = vor.u32 %v1814_v60, %v1654_v0  ;;  %s2662_s19 = smul.u32 6, %s2801_s24 }
  0x3d   : > { %911 = vmatpush.bf16.msra.mxu1 %v2232_v27  ;;  %2750 = vst [vmem:[#allocation13_spill] sm:$0xff] %v2280_v4  ;;  %v1792_v11 = vld [vmem:[%s2082_s30 + $0xa0] sm:$0xf0]  ;;  %v1660_v13 = vld [vmem:[%s2082_s30 + $0x158] sm:$0xf]  ;;  %v2292_v20 = vor.u32 %v1838_v1, %v1750_v2 }
  0x3e   : > { %924 = vmatpush.bf16.msra.mxu2 %v2234_v28  ;;  %937 = vmatpush.bf16.msra.mxu3 %v2240_v35  ;;  %v1816_v15 = vld [vmem:[%s2082_s30 + $0x160] sm:$0xf0]  ;;  %v1811_v22 = vld [vmem:[%s2082_s30 + $0x13c] sm:$0xf]  ;;  %v2297_v24 = vor.u32 %v1792_v11, %v1564_v10  ;;  %v1642_v26 = vld [vmem:[%s2082_s30 + $0x144] sm:$0xf0]  ;;  %s384_s27 = scalar_lea.vmem %s2702_s4, %s2662_s19  ;;  %s394_s10 = scalar_lea.vmem %s2704_s6, %s2662_s19 }
  0x3f   : > { %v499_v18 = vld [vmem:[%s361_s12] sm:$0x7]  ;;  %v1835_v30 = vld [vmem:[%s2082_s30 + $0x1fc] sm:$0xf]  ;;  %v2303_v32 = vor.u32 %v1816_v15, %v1660_v13  ;;  %v1552_v36 = vld [vmem:[%s2082_s30 + $0x80] sm:$0xf]  ;;  %v2315_v41 = vor.u32 %v1811_v22, %v1642_v26 }
  0x40   : > { %899 = vmatpush.bf16.msra.mxu0 %v2249_v43  ;;  %501 = vst [vmem:[#allocation1] ss:$9 sm:$0xff] %v499_v18  ;;  %v1738_v31 = vld [vmem:[%s2082_s30 + $0x204] sm:$0xf0]  ;;  %v1789_v37 = vld [vmem:[%s2082_s30 + $0x88] sm:$0xf0] }
  0x41   : > { %912 = vmatpush.bf16.msra.mxu1 %v2256_v51  ;;  %2751 = vst [vmem:[#allocation14_spill] sm:$0xff] %v2297_v24  ;;  %v1648_v39 = vld [vmem:[%s2082_s30 + $0x140] sm:$0xf]  ;;  %v1813_v40 = vld [vmem:[%s2082_s30 + $0x148] sm:$0xf0]  ;;  %v2317_v42 = vor.u32 %v1835_v30, %v1738_v31  ;;  %v2323_v53 = vor.u32 %v1789_v37, %v1552_v36 }
  0x42   : > { %925 = vmatpush.bf16.msra.mxu2 %v2258_v52  ;;  %938 = vmatpush.bf16.msra.mxu3 %v2274_v63  ;;  %2752 = vst [vmem:[#allocation15_spill] sm:$0xff] %v2303_v32  ;;  %v1808_v47 = vld [vmem:[%s2082_s30 + $0x124] sm:$0xf]  ;;  %v1630_v48 = vld [vmem:[%s2082_s30 + $0x12c] sm:$0xf0]  ;;  %v2328_v1 = vor.u32 %v1813_v40, %v1648_v39 }
  0x43   : > { %v1832_v49 = vld [vmem:[%s2082_s30 + $0x1e4] sm:$0xf]  ;;  %2753 = vst [vmem:[#allocation16_spill] sm:$0xff] %v2323_v53  ;;  %v1726_v54 = vld [vmem:[%s2082_s30 + $0x1ec] sm:$0xf0]  ;;  %v2341_v22 = vor.u32 %v1808_v47, %v1630_v48 }
  0x44   : > { %944 = vmatpush.bf16.msrb.mxu0 %v2263_v55  ;;  %v1540_v60 = vld [vmem:[%s2082_s30 + $0x68] sm:$0xf]  ;;  %2754 = vst [vmem:[#allocation17_spill] sm:$0xff] %v2328_v1  ;;  %v1786_v2 = vld [vmem:[%s2082_s30 + $0x70] sm:$0xf0]  ;;  %v2343_v26 = vor.u32 %v1832_v49, %v1726_v54 }
  0x45   : > { %957 = vmatpush.bf16.msrb.mxu1 %v2265_v59  ;;  %v1022_v0 = vld [vmem:[%s368_s15] sm:$0x7]  ;;  %v1810_v11 = vld [vmem:[%s2082_s30 + $0x130] sm:$0xf0]  ;;  %v1805_v30 = vld [vmem:[%s2082_s30 + $0x10c] sm:$0xf]  ;;  %v2347_v31 = vor.u32 %v1786_v2, %v1540_v60 }
  0x46   : > { %970 = vmatpush.bf16.msrb.mxu2 %v2272_v61  ;;  %983 = vmatpush.bf16.msrb.mxu3 %v2280_v4  ;;  %v1636_v10 = vld [vmem:[%s2082_s30 + $0x128] sm:$0xf]  ;;  %v1618_v36 = vld [vmem:[%s2082_s30 + $0x114] sm:$0xf0]  ;;  %v1829_v37 = vld [vmem:[%s2082_s30 + $0x1cc] sm:$0xf] }
  0x47   : > { %v2333_v13 = vld [vmem:[#allocation1] sm:$0xff]  ;;  %v2335_v15 = vld [vmem:[#allocation1 + $0x9] sm:$0xff]  ;;  %v2337_v18 = vld [vmem:[#allocation1 + $0x12] sm:$0xff]  ;;  %2755 = vst [vmem:[#allocation18_spill] sm:$0xff] %v2347_v31  ;;  %v2354_v40 = vor.u32 %v1810_v11, %v1636_v10  ;;  %v2365_v60 = vor.u32 %v1805_v30, %v1618_v36 }
  0x48   : > { %945 = vmatpush.bf16.msrb.mxu0 %v2290_v19  ;;  %1024 = vst [vmem:[#allocation1] ss:$9 sm:$0xff] %v1022_v0  ;;  %v1714_v39 = vld [vmem:[%s2082_s30 + $0x1d4] sm:$0xf0]  ;;  %v1528_v47 = vld [vmem:[%s2082_s30 + $0x50] sm:$0xf]  ;;  %913 = vmatmul.bf16.vlgmr.msra.gmra.mxu1 %v2335_v15 }
  0x49   : > { %958 = vmatpush.bf16.msrb.mxu1 %v2292_v20  ;;  %900 = vmatmul.bf16.vlgmr.msra.gmra.mxu0 %v2333_v13  ;;  %2756 = vst [vmem:[#allocation19_spill] sm:$0xff] %v2354_v40  ;;  %v1783_v48 = vld [vmem:[%s2082_s30 + $0x58] sm:$0xf0]  ;;  %v1624_v49 = vld [vmem:[%s2082_s30 + $0x110] sm:$0xf]  ;;  %v2367_v0 = vor.u32 %v1829_v37, %v1714_v39 }
  0x4a   : > { %971 = vmatpush.bf16.msrb.mxu2 %v2297_v24  ;;  %984 = vmatpush.bf16.msrb.mxu3 %v2303_v32  ;;  %v1807_v54 = vld [vmem:[%s2082_s30 + $0x118] sm:$0xf0]  ;;  %2757 = vst [vmem:[#allocation20_spill] sm:$0xff] %v2365_v60  ;;  %v1802_v2 = vld [vmem:[%s2082_s30 + $0xf4] sm:$0xf]  ;;  %v2371_v10 = vor.u32 %v1783_v48, %v1528_v47 }
  0x4b   : > { %926 = vmatmul.bf16.vlgmr.msra.gmra.mxu2 %v2337_v18  ;;  %939 = vmatmul.bf16.vlgmr.msra.gmra.mxu3 %v2333_v13  ;;  %2758 = vst [vmem:[#allocation21_spill] sm:$0xff] %v2367_v0  ;;  %v1606_v11 = vld [vmem:[%s2082_s30 + $0xfc] sm:$0xf0]  ;;  %v2377_v4 = vor.u32 %v1807_v54, %v1624_v49  ;;  %v1516_v30 = vld [vmem:[%s2082_s30 + $0x38] sm:$0xf] }
  0x4c   : > { %946 = vmatpush.bf16.msrb.mxu0 %v2315_v41  ;;  %2759 = vst [vmem:[#allocation22_spill] sm:$0xff] %v2371_v10  ;;  %v1702_v32 = vld [vmem:[%s2082_s30 + $0x1bc] sm:$0xf0]  ;;  %v1780_v36 = vld [vmem:[%s2082_s30 + $0x40] sm:$0xf0]  ;;  %v2385_v47 = vor.u32 %v1802_v2, %v1606_v11 }
  0x4d   : > { %959 = vmatpush.bf16.msrb.mxu1 %v2317_v42  ;;  %2760 = vst [vmem:[#allocation23_spill] sm:$0xff] %v2377_v4  ;;  %v1612_v37 = vld [vmem:[%s2082_s30 + $0xf8] sm:$0xf]  ;;  %v1804_v39 = vld [vmem:[%s2082_s30 + $0x100] sm:$0xf0]  ;;  %v2391_v49 = vor.u32 %v1780_v36, %v1516_v30 }
  0x4e   : > { %972 = vmatpush.bf16.msrb.mxu2 %v2323_v53  ;;  %985 = vmatpush.bf16.msrb.mxu3 %v2328_v1  ;;  %v1826_v1 = vld [vmem:[%s2082_s30 + $0x1b4] sm:$0xf]  ;;  %2761 = vst [vmem:[#allocation24_spill] sm:$0xff] %v2385_v47  ;;  %v1799_v63 = vld [vmem:[%s2082_s30 + $0xdc] sm:$0xf]  ;;  %v2397_v14 = vor.u32 %v1804_v39, %v1612_v37 }
  0x4f   : > { %v2387_v48 = vor.u32 %v1826_v1, %v1702_v32  ;;  %2763 = vst [vmem:[#allocation26_spill] sm:$0xff] %v2391_v49  ;;  %v1594_v54 = vld [vmem:[%s2082_s30 + $0xe4] sm:$0xf0]  ;;  %v1504_v2 = vld [vmem:[%s2082_s30 + $0x20] sm:$0xf] }
  0x50   : > { %947 = vmatpush.bf16.msrb.mxu0 %v2341_v22  ;;  %v1690_v35 = vld [vmem:[%s2082_s30 + $0x1a4] sm:$0xf0]  ;;  %2764 = vst [vmem:[#allocation27_spill] sm:$0xff] %v2397_v14  ;;  %v1777_v32 = vld [vmem:[%s2082_s30 + $0x28] sm:$0xf0]  ;;  %v2405_v30 = vor.u32 %v1799_v63, %v1594_v54 }
  0x51   : > { %960 = vmatpush.bf16.msrb.mxu1 %v2343_v26  ;;  %2762 = vst [vmem:[#allocation25_spill] sm:$0xff] %v2387_v48  ;;  %v1600_v1 = vld [vmem:[%s2082_s30 + $0xe0] sm:$0xf]  ;;  %v1801_v11 = vld [vmem:[%s2082_s30 + $0xe8] sm:$0xf0]  ;;  %v2412_v37 = vor.u32 %v1777_v32, %v1504_v2 }
  0x52   : > { %973 = vmatpush.bf16.msrb.mxu2 %v2347_v31  ;;  %986 = vmatpush.bf16.msrb.mxu3 %v2354_v40  ;;  %v1823_v40 = vld [vmem:[%s2082_s30 + $0x19c] sm:$0xf]  ;;  %2765 = vst [vmem:[#allocation28_spill] sm:$0xff] %v2405_v30  ;;  %v1820_v39 = vld [vmem:[%s2082_s30 + $0x184] sm:$0xf] }
  0x53   : > { %v2407_v36 = vor.u32 %v1823_v40, %v1690_v35  ;;  %2766 = vst [vmem:[#allocation29_spill] sm:$0xff] %v2412_v37  ;;  %v1774_v63 = vld [vmem:[%s2082_s30 + $0x10] sm:$0xf0]  ;;  %v1768_v35 = vld [vmem:[%s2082_s30 + $0x230] sm:$0xf] }
  0x54   : > { %948 = vmatpush.bf16.msrb.mxu0 %v2365_v60  ;;  %v1492_v60 = vld [vmem:[%s2082_s30 + $0x8] sm:$0xf]  ;;  %v1843_v40 = vld [vmem:[%s2082_s30 + $0x238] sm:$0xf0] }
  0x55   : > { %961 = vmatpush.bf16.msrb.mxu1 %v2367_v0  ;;  %v1678_v0 = vld [vmem:[%s2082_s30 + $0x18c] sm:$0xf0]  ;;  %v1588_v32 = vld [vmem:[%s2082_s30 + $0xc8] sm:$0xf] }
  0x56   : > { %974 = vmatpush.bf16.msrb.mxu2 %v2371_v10  ;;  %987 = vmatpush.bf16.msrb.mxu3 %v2377_v4  ;;  %v1796_v10 = vld [vmem:[%s2082_s30 + $0xc4] sm:$0xf]  ;;  %v1582_v4 = vld [vmem:[%s2082_s30 + $0xcc] sm:$0xf0]  ;;  %v2427_v2 = vor.u32 %v1820_v39, %v1678_v0  ;;  %v1837_v0 = vld [vmem:[%s2082_s30 + $0x208] sm:$0xf0] }
  0x57   : > { %v2425_v54 = vor.u32 %v1796_v10, %v1582_v4 }
  0x58   : > { %949 = vmatpush.bf16.msrb.mxu0 %v2385_v47 }
  0x59   : > { %962 = vmatpush.bf16.msrb.mxu1 %v2387_v48  ;;  %v2418_v48 = vor.u32 %v1801_v11, %v1600_v1  ;;  %v2434_v1 = vor.u32 %v1843_v40, %v1768_v35  ;;  %v1756_v11 = vld [vmem:[%s2082_s30 + $0x218] sm:$0xf]  ;;  %v1828_v40 = vld [vmem:[%s2082_s30 + $0x1c0] sm:$0xf0] }
  0x5a   : > { %975 = vmatpush.bf16.msrb.mxu2 %v2391_v49  ;;  %988 = vmatpush.bf16.msrb.mxu3 %v2397_v14  ;;  %v1798_v49 = vld [vmem:[%s2082_s30 + $0xd0] sm:$0xf0]  ;;  %v2432_v14 = vor.u32 %v1774_v63, %v1492_v60  ;;  %v1744_v60 = vld [vmem:[%s2082_s30 + $0x200] sm:$0xf]  ;;  %v1831_v63 = vld [vmem:[%s2082_s30 + $0x1d8] sm:$0xf0] }
  0x5b   : > { %v2439_v47 = vor.u32 %v1798_v49, %v1588_v32  ;;  %v2456_v10 = vor.u32 %v1837_v0, %v1744_v60  ;;  %v1732_v49 = vld [vmem:[%s2082_s30 + $0x1e8] sm:$0xf]  ;;  %v1825_v60 = vld [vmem:[%s2082_s30 + $0x1a8] sm:$0xf0] }
  0x5c   : > { %950 = vmatpush.bf16.msrb.mxu0 %v2405_v30  ;;  %v1840_v30 = vld [vmem:[%s2082_s30 + $0x220] sm:$0xf0] }
  0x5d   : > { %963 = vmatpush.bf16.msrb.mxu1 %v2407_v36  ;;  %v2445_v4 = vor.u32 %v1840_v30, %v1756_v11  ;;  %v1834_v30 = vld [vmem:[%s2082_s30 + $0x1f0] sm:$0xf0]  ;;  %v1696_v11 = vld [vmem:[%s2082_s30 + $0x1a0] sm:$0xf] }
  0x5e   : > { %976 = vmatpush.bf16.msrb.mxu2 %v2412_v37  ;;  %989 = vmatpush.bf16.msrb.mxu3 %v2418_v48  ;;  %v2466_v39 = vor.u32 %v1834_v30, %v1732_v49  ;;  %v2490_v0 = vor.u32 %v1825_v60, %v1696_v11  ;;  %v1684_v49 = vld [vmem:[%s2082_s30 + $0x188] sm:$0xf]  ;;  %v1822_v30 = vld [vmem:[%s2082_s30 + $0x190] sm:$0xf0] }
  0x5f   : > { %v1159_v11 = vld [vmem:[%s375_s18] sm:$0x7] }
  0x60   : > { %951 = vmatpush.bf16.msrb.mxu0 %v2425_v54  ;;  %v2768_v60 = vld [vmem:[#allocation21_spill] sm:$0xff] }
  0x61   : > { %964 = vmatpush.bf16.msrb.mxu1 %v2427_v2 }
  0x62   : > { %977 = vmatpush.bf16.msrb.mxu2 %v2432_v14  ;;  %990 = vmatpush.bf16.msrb.mxu3 %v2439_v47 }
  0x63   : > { %952 = vmatmul.bf16.vlgmr.msrb.gmra.mxu0 %v2335_v15 }
  0x64   : > { %996 = vmatpush.bf16.msra.mxu0 %v2434_v1  ;;  %965 = vmatmul.bf16.vlgmr.msrb.gmra.mxu1 %v2337_v18 }
  0x65   : > { %1031 = vmatpush.bf16.msra.mxu1 %v2091_v3  ;;  %978 = vmatmul.bf16.vlgmr.msrb.gmra.mxu2 %v2333_v13  ;;  %v1720_v13 = vld [vmem:[%s2082_s30 + $0x1d0] sm:$0xf] }
  0x66   : > { %1044 = vmatpush.bf16.msra.mxu2 %v2096_v7  ;;  %1057 = vmatpush.bf16.msra.mxu3 %v2098_v8  ;;  %v2474_v35 = vor.u32 %v1831_v63, %v1720_v13  ;;  %v2498_v13 = vor.u32 %v1822_v30, %v1684_v49  ;;  %v2506_v63 = vld [vmem:[#allocation1 + $0x9] sm:$0xff]  ;;  %v2770_v30 = vld [vmem:[#allocation8_spill] sm:$0xff] }
  0x67   : > { %991 = vmatmul.bf16.vlgmr.msrb.gmra.mxu3 %v2335_v15  ;;  %v1708_v15 = vld [vmem:[%s2082_s30 + $0x1b8] sm:$0xf]  ;;  %v2769_v49 = vld [vmem:[#allocation22_spill] sm:$0xff]  ;;  %s389_s30 = scalar_lea.vmem %s2703_s5, %s2662_s19 }
  0x68   : > { %997 = vmatpush.bf16.msra.mxu0 %v2445_v4  ;;  %v2482_v32 = vor.u32 %v1828_v40, %v1708_v15  ;;  %v1025_v15 = vld [vmem:[#allocation1] sm:$0xff]  ;;  %v2509_v40 = vld [vmem:[#allocation1 + $0x12] sm:$0xff] }
  0x69   : > { %1032 = vmatpush.bf16.msra.mxu1 %v2111_v16  ;;  %1161 = vst [vmem:[#allocation1] ss:$9 sm:$0xff] %v1159_v11  ;;  %v2771_v11 = vld [vmem:[#allocation24_spill] sm:$0xff] }
  0x6a   : > { %1045 = vmatpush.bf16.msra.mxu2 %v2113_v17  ;;  %1058 = vmatpush.bf16.msra.mxu3 %v2119_v21 }
  0x6c   : > { %998 = vmatpush.bf16.msra.mxu0 %v2456_v10 }
  0x6d   : > { %1033 = vmatpush.bf16.msra.mxu1 %v2130_v29 }
  0x6e   : > { %1046 = vmatpush.bf16.msra.mxu2 %v2137_v33  ;;  %1059 = vmatpush.bf16.msra.mxu3 %v2139_v34 }
  0x70   : > { %999 = vmatpush.bf16.msra.mxu0 %v2466_v39 }
  0x71   : > { %1034 = vmatpush.bf16.msra.mxu1 %v2153_v44 }
  0x72   : > { %1047 = vmatpush.bf16.msra.mxu2 %v2157_v45  ;;  %1060 = vmatpush.bf16.msra.mxu3 %v2159_v46 }
  0x74   : > { %1000 = vmatpush.bf16.msra.mxu0 %v2474_v35 }
  0x75   : > { %1035 = vmatpush.bf16.msra.mxu1 %v2173_v56 }
  0x76   : > { %1048 = vmatpush.bf16.msra.mxu2 %v2178_v57  ;;  %1061 = vmatpush.bf16.msra.mxu3 %v2180_v58 }
  0x78   : > { %1001 = vmatpush.bf16.msra.mxu0 %v2482_v32 }
  0x79   : > { %1036 = vmatpush.bf16.msra.mxu1 %v2194_v5 }
  0x7a   : > { %1049 = vmatpush.bf16.msra.mxu2 %v2204_v6  ;;  %1062 = vmatpush.bf16.msra.mxu3 %v2206_v9 }
  0x7c   : > { %1002 = vmatpush.bf16.msra.mxu0 %v2490_v0 }
  0x7d   : > { %1037 = vmatpush.bf16.msra.mxu1 %v2220_v23 }
  0x7e   : > { %1050 = vmatpush.bf16.msra.mxu2 %v2232_v27  ;;  %1063 = vmatpush.bf16.msra.mxu3 %v2234_v28 }
  0x80   : > { %1003 = vmatpush.bf16.msra.mxu0 %v2498_v13 }
  0x81   : > { %1038 = vmatpush.bf16.msra.mxu1 %v2249_v43 }
  0x82   : > { %1051 = vmatpush.bf16.msra.mxu2 %v2256_v51  ;;  %1064 = vmatpush.bf16.msra.mxu3 %v2258_v52  ;;  %v2775_v52 = vld [vmem:[#allocation28_spill] sm:$0xff] }
  0x83   : > { %1004 = vmatmul.bf16.vlgmr.msra.gmra.mxu0 %v2337_v18  ;;  %v2767_v18 = vld [vmem:[#allocation20_spill] sm:$0xff] }
  0x84   : > { %1070 = vmatpush.bf16.msrb.mxu0 %v2104_v12  ;;  %1039 = vmatmul.bf16.vlgmr.msra.gmra.mxu1 %v1025_v15 }
  0x85   : > { %1083 = vmatpush.bf16.msrb.mxu1 %v2263_v55  ;;  %1052 = vmatmul.bf16.vlgmr.msra.gmra.mxu2 %v2506_v63 }
  0x86   : > { %1096 = vmatpush.bf16.msrb.mxu2 %v2265_v59  ;;  %1109 = vmatpush.bf16.msrb.mxu3 %v2272_v61  ;;  %v2774_v61 = vld [vmem:[#allocation9_spill] sm:$0xff] }
  0x87   : > { %1065 = vmatmul.bf16.vlgmr.msra.gmra.mxu3 %v2509_v40 }
  0x88   : > { %1071 = vmatpush.bf16.msrb.mxu0 %v2124_v25 }
  0x89   : > { %1084 = vmatpush.bf16.msrb.mxu1 %v2290_v19 }
  0x8a   : > { %1097 = vmatpush.bf16.msrb.mxu2 %v2292_v20  ;;  %1110 = vmatpush.bf16.msrb.mxu3 %v2297_v24  ;;  %v2773_v24 = vld [vmem:[#allocation26_spill] sm:$0xff] }
  0x8c   : > { %1072 = vmatpush.bf16.msrb.mxu0 %v2145_v38 }
  0x8d   : > { %1085 = vmatpush.bf16.msrb.mxu1 %v2315_v41 }
  0x8e   : > { %1098 = vmatpush.bf16.msrb.mxu2 %v2317_v42  ;;  %1111 = vmatpush.bf16.msrb.mxu3 %v2323_v53  ;;  %v2772_v53 = vld [vmem:[#allocation25_spill] sm:$0xff] }
  0x90   : > { %1073 = vmatpush.bf16.msrb.mxu0 %v2165_v50 }
  0x91   : > { %1086 = vmatpush.bf16.msrb.mxu1 %v2341_v22 }
  0x92   : > { %1099 = vmatpush.bf16.msrb.mxu2 %v2343_v26  ;;  %1112 = vmatpush.bf16.msrb.mxu3 %v2347_v31  ;;  %v2776_v31 = vld [vmem:[#allocation12_spill] sm:$0xff] }
  0x94   : > { %1074 = vmatpush.bf16.msrb.mxu0 %v2186_v62 }
  0x95   : > { %1087 = vmatpush.bf16.msrb.mxu1 %v2767_v18 }
  0x96   : > { %1100 = vmatpush.bf16.msrb.mxu2 %v2768_v60  ;;  %1113 = vmatpush.bf16.msrb.mxu3 %v2769_v49  ;;  %v2777_v49 = vld [vmem:[#allocation13_spill] sm:$0xff] }
  0x98   : > { %1075 = vmatpush.bf16.msrb.mxu0 %v2770_v30 }
  0x99   : > { %1088 = vmatpush.bf16.msrb.mxu1 %v2771_v11 }
  0x9a   : > { %1101 = vmatpush.bf16.msrb.mxu2 %v2772_v53  ;;  %1114 = vmatpush.bf16.msrb.mxu3 %v2773_v24  ;;  %v2779_v24 = vld [vmem:[#allocation17_spill] sm:$0xff] }
  0x9c   : > { %1076 = vmatpush.bf16.msrb.mxu0 %v2774_v61 }
  0x9d   : > { %1089 = vmatpush.bf16.msrb.mxu1 %v2775_v52 }
  0x9e   : > { %1102 = vmatpush.bf16.msrb.mxu2 %v2407_v36  ;;  %1115 = vmatpush.bf16.msrb.mxu3 %v2412_v37  ;;  %v2778_v37 = vld [vmem:[#allocation15_spill] sm:$0xff] }
  0xa0   : > { %1077 = vmatpush.bf16.msrb.mxu0 %v2776_v31 }
  0xa1   : > { %1090 = vmatpush.bf16.msrb.mxu1 %v2425_v54 }
  0xa2   : > { %1103 = vmatpush.bf16.msrb.mxu2 %v2427_v2  ;;  %1116 = vmatpush.bf16.msrb.mxu3 %v2432_v14 }
  0xa3   : > { %1078 = vmatmul.bf16.vlgmr.msrb.gmra.mxu0 %v1025_v15 }
  0xa4   : > { %1122 = vmatpush.bf16.msra.mxu0 %v2777_v49  ;;  %1091 = vmatmul.bf16.vlgmr.msrb.gmra.mxu1 %v2506_v63 }
  0xa5   : > { %1135 = vmatpush.bf16.msra.mxu1 %v2434_v1  ;;  %1104 = vmatmul.bf16.vlgmr.msrb.gmra.mxu2 %v2509_v40 }
  0xa6   : > { %1168 = vmatpush.bf16.msra.mxu2 %v2091_v3  ;;  %1181 = vmatpush.bf16.msra.mxu3 %v2096_v7  ;;  %v2780_v3 = vld [vmem:[#allocation19_spill] sm:$0xff] }
  0xa7   : > { %1117 = vmatmul.bf16.vlgmr.msrb.gmra.mxu3 %v1025_v15  ;;  %v2781_v7 = vld [vmem:[#allocation23_spill] sm:$0xff] }
  0xa8   : > { %1123 = vmatpush.bf16.msra.mxu0 %v2778_v37 }
  0xa9   : > { %1136 = vmatpush.bf16.msra.mxu1 %v2445_v4 }
  0xaa   : > { %1169 = vmatpush.bf16.msra.mxu2 %v2111_v16  ;;  %1182 = vmatpush.bf16.msra.mxu3 %v2113_v17  ;;  %v2782_v16 = vld [vmem:[#allocation27_spill] sm:$0xff]  ;;  %v2585_v17 = vld [vmem:[#allocation1] sm:$0xff] }
  0xac   : > { %1124 = vmatpush.bf16.msra.mxu0 %v2779_v24 }
  0xad   : > { %1137 = vmatpush.bf16.msra.mxu1 %v2456_v10 }
  0xae   : > { %1170 = vmatpush.bf16.msra.mxu2 %v2130_v29  ;;  %1183 = vmatpush.bf16.msra.mxu3 %v2137_v33  ;;  %v2591_v29 = vld [vmem:[#allocation1 + $0x9] sm:$0xff] }
  0xb0   : > { %1125 = vmatpush.bf16.msra.mxu0 %v2780_v3 }
  0xb1   : > { %1138 = vmatpush.bf16.msra.mxu1 %v2466_v39 }
  0xb2   : > { %1171 = vmatpush.bf16.msra.mxu2 %v2153_v44  ;;  %1184 = vmatpush.bf16.msra.mxu3 %v2157_v45  ;;  %v2784_v44 = vld [vmem:[#allocation11_spill] sm:$0xff] }
  0xb3   : > { %v1164_v45 = vld [vmem:[#allocation1 + $0x12] sm:$0xff] }
  0xb4   : > { %1126 = vmatpush.bf16.msra.mxu0 %v2781_v7 }
  0xb5   : > { %1139 = vmatpush.bf16.msra.mxu1 %v2474_v35 }
  0xb6   : > { %1172 = vmatpush.bf16.msra.mxu2 %v2173_v56  ;;  %1185 = vmatpush.bf16.msra.mxu3 %v2178_v57  ;;  %v2785_v56 = vld [vmem:[#allocation14_spill] sm:$0xff] }
  0xb8   : > { %1127 = vmatpush.bf16.msra.mxu0 %v2782_v16 }
  0xb9   : > { %1140 = vmatpush.bf16.msra.mxu1 %v2482_v32 }
  0xba   : > { %1173 = vmatpush.bf16.msra.mxu2 %v2194_v5  ;;  %1186 = vmatpush.bf16.msra.mxu3 %v2204_v6  ;;  %v2787_v6 = vld [vmem:[#allocation18_spill] sm:$0xff] }
  0xbc   : > { %1128 = vmatpush.bf16.msra.mxu0 %v2418_v48 }
  0xbd   : > { %1141 = vmatpush.bf16.msra.mxu1 %v2490_v0 }
  0xbe   : > { %1174 = vmatpush.bf16.msra.mxu2 %v2220_v23  ;;  %1187 = vmatpush.bf16.msra.mxu3 %v2232_v27 }
  0xc0   : > { %1129 = vmatpush.bf16.msra.mxu0 %v2439_v47 }
  0xc1   : > { %1142 = vmatpush.bf16.msra.mxu1 %v2498_v13 }
  0xc2   : > { %1175 = vmatpush.bf16.msra.mxu2 %v2249_v43  ;;  %1188 = vmatpush.bf16.msra.mxu3 %v2256_v51  ;;  %v2789_v51 = vld [vmem:[#allocation26_spill] sm:$0xff] }
  0xc3   : > { %1130 = vmatmul.bf16.vlgmr.msra.gmra.mxu0 %v2506_v63 }
  0xc4   : > { %1194 = vmatpush.bf16.msrb.mxu0 %v2098_v8  ;;  %1143 = vmatmul.bf16.vlgmr.msra.gmra.mxu1 %v2509_v40 }
  0xc5   : > { %1207 = vmatpush.bf16.msrb.mxu1 %v2104_v12  ;;  %1176 = vmatmul.bf16.vlgmr.msra.gmra.mxu2 %v2585_v17  ;;  %v2613_v12 = vpop.f32.mrf.mxu1 }
  0xc6   : > { %1220 = vmatpush.bf16.msrb.mxu2 %v2263_v55  ;;  %1233 = vmatpush.bf16.msrb.mxu3 %v2265_v59  ;;  %v2610_v8 = vpop.f32.mrf.mxu0 }
  0xc7   : > { %1189 = vmatmul.bf16.vlgmr.msra.gmra.mxu3 %v2591_v29 }
  0xc8   : > { %1195 = vmatpush.bf16.msrb.mxu0 %v2119_v21 }
  0xc9   : > { %1208 = vmatpush.bf16.msrb.mxu1 %v2124_v25 }
  0xca   : > { %1221 = vmatpush.bf16.msrb.mxu2 %v2290_v19  ;;  %1234 = vmatpush.bf16.msrb.mxu3 %v2292_v20  ;;  %v915_v19 = vadd.f32 %v2613_v12, %v2610_v8 }
  0xcc   : > { %1196 = vmatpush.bf16.msrb.mxu0 %v2139_v34 }
  0xcd   : > { %1209 = vmatpush.bf16.msrb.mxu1 %v2145_v38  ;;  %v916_v33 = vpop.f32.mrf.mxu1  ;;  %v2783_v38 = vld [vmem:[#allocation10_spill] sm:$0xff] }
  0xce   : > { %1222 = vmatpush.bf16.msrb.mxu2 %v2315_v41  ;;  %1235 = vmatpush.bf16.msrb.mxu3 %v2317_v42  ;;  %v903_v21 = vpop.f32.mrf.mxu0  ;;  %v927_v25 = vpop.f32.mrf.mxu2 }
  0xcf   : > { %v940_v34 = vpop.f32.mrf.mxu3  ;;  %v928_v41 = vadd.f32 %v927_v25, %v915_v19 }
  0xd0   : > { %1197 = vmatpush.bf16.msrb.mxu0 %v2159_v46  ;;  %v1991_v46 = vmov 0.0  }
  0xd1   : > { %1210 = vmatpush.bf16.msrb.mxu1 %v2165_v50  ;;  %399 = vst [vmem:[#allocation2] sm:$0x3f] %v1991_v46 }
  0xd2   : > { %1223 = vmatpush.bf16.msrb.mxu2 %v2341_v22  ;;  %1236 = vmatpush.bf16.msrb.mxu3 %v2343_v26  ;;  %400 = vst [vmem:[#allocation3] sm:$0x3f] %v1991_v46 }
  0xd3   : > { %401 = vst [vmem:[#allocation4] sm:$0x3f] %v1991_v46 }
  0xd4   : > { %1198 = vmatpush.bf16.msrb.mxu0 %v2180_v58  ;;  %v2786_v58 = vld [vmem:[#allocation16_spill] sm:$0xff] }
  0xd5   : > { %1211 = vmatpush.bf16.msrb.mxu1 %v2186_v62 }
  0xd6   : > { %1224 = vmatpush.bf16.msrb.mxu2 %v2767_v18  ;;  %1237 = vmatpush.bf16.msrb.mxu3 %v2768_v60  ;;  %v929_v50 = vpop.f32.mrf.mxu2 }
  0xd7   : > { %v942_v57 = vpop.f32.mrf.mxu3 }
  0xd8   : > { %1199 = vmatpush.bf16.msrb.mxu0 %v2206_v9  ;;  %v2788_v9 = vld [vmem:[#allocation22_spill] sm:$0xff] }
  0xd9   : > { %1212 = vmatpush.bf16.msrb.mxu1 %v2770_v30  ;;  %v498_v26 = vld [vmem:[#allocation2] sm:$0x3f]  ;;  %v1021_v8 = vld [vmem:[#allocation3] sm:$0x3f] }
  0xda   : > { %1225 = vmatpush.bf16.msrb.mxu2 %v2771_v11  ;;  %1238 = vmatpush.bf16.msrb.mxu3 %v2772_v53 }
  0xdc   : > { %1200 = vmatpush.bf16.msrb.mxu0 %v2234_v28 }
  0xdd   : > { %1213 = vmatpush.bf16.msrb.mxu1 %v2774_v61 }
  0xde   : > { %1226 = vmatpush.bf16.msrb.mxu2 %v2775_v52  ;;  %1239 = vmatpush.bf16.msrb.mxu3 %v2407_v36  ;;  %v2790_v52 = vld [vmem:[#allocation29_spill] sm:$0xff] }
  0xe0   : > { %1201 = vmatpush.bf16.msrb.mxu0 %v2783_v38  ;;  %v953_v62 = vpop.f32.mrf.mxu0 }
  0xe1   : > { %1214 = vmatpush.bf16.msrb.mxu1 %v2776_v31  ;;  %v966_v5 = vpop.f32.mrf.mxu1  ;;  %v954_v61 = vadd.f32 %v953_v62, %v940_v34 }
  0xe2   : > { %1227 = vmatpush.bf16.msrb.mxu2 %v2425_v54  ;;  %1240 = vmatpush.bf16.msrb.mxu3 %v2427_v2 }
  0xe3   : > { %1202 = vmatmul.bf16.vlgmr.msrb.gmra.mxu0 %v1164_v45  ;;  %v967_v20 = vadd.f32 %v966_v5, %v954_v61 }
  0xe4   : > { %1246 = vmatpush.bf16.msra.mxu0 %v2784_v44  ;;  %1215 = vmatmul.bf16.vlgmr.msrb.gmra.mxu1 %v2585_v17 }
  0xe5   : > { %1259 = vmatpush.bf16.msra.mxu1 %v2777_v49  ;;  %1228 = vmatmul.bf16.vlgmr.msrb.gmra.mxu2 %v2591_v29  ;;  %v1012_v42 = vrot.slane %v967_v20, 6 }
  0xe6   : > { %1272 = vmatpush.bf16.msra.mxu2 %v2434_v1  ;;  %1241 = vmatmul.bf16.vlgmr.msrb.gmra.mxu3 %v1164_v45 }
  0xe8   : > { %1247 = vmatpush.bf16.msra.mxu0 %v2785_v56  ;;  %v955_v23 = vpop.f32.mrf.mxu0  ;;  %v979_v27 = vpop.f32.mrf.mxu2 }
  0xe9   : > { %1260 = vmatpush.bf16.msra.mxu1 %v2778_v37  ;;  %v968_v28 = vpop.f32.mrf.mxu1 }
  0xea   : > { %1273 = vmatpush.bf16.msra.mxu2 %v2445_v4  ;;  %v992_v43 = vpop.f32.mrf.mxu3 }
  0xec   : > { %1248 = vmatpush.bf16.msra.mxu0 %v2786_v58 }
  0xed   : > { %1261 = vmatpush.bf16.msra.mxu1 %v2779_v24  ;;  %v993_v24 = vadd.f32 %v992_v43, %v979_v27 }
  0xee   : > { %1274 = vmatpush.bf16.msra.mxu2 %v2456_v10 }
  0xf0   : > { %1249 = vmatpush.bf16.msra.mxu0 %v2787_v6  ;;  %v981_v55 = vpop.f32.mrf.mxu2 }
  0xf1   : > { %1262 = vmatpush.bf16.msra.mxu1 %v2780_v3 }
  0xf2   : > { %1275 = vmatpush.bf16.msra.mxu2 %v2466_v39  ;;  %v994_v59 = vpop.f32.mrf.mxu3 }
  0xf4   : > { %1250 = vmatpush.bf16.msra.mxu0 %v2788_v9 }
  0xf5   : > { %1263 = vmatpush.bf16.msra.mxu1 %v2781_v7 }
  0xf6   : > { %1276 = vmatpush.bf16.msra.mxu2 %v2474_v35 }
  0xf8   : > { %1251 = vmatpush.bf16.msra.mxu0 %v2789_v51 }
  0xf9   : > { %1264 = vmatpush.bf16.msra.mxu1 %v2782_v16 }
  0xfa   : > { %1277 = vmatpush.bf16.msra.mxu2 %v2482_v32 }
  0xfc   : > { %1252 = vmatpush.bf16.msra.mxu0 %v2790_v52 }
  0xfd   : > { %1265 = vmatpush.bf16.msra.mxu1 %v2418_v48 }
  0xfe   : > { %1278 = vmatpush.bf16.msra.mxu2 %v2490_v0 }
 0x100   : > { %1253 = vmatpush.bf16.msra.mxu0 %v2432_v14  ;;  %v1005_v53 = vpop.f32.mrf.mxu0 }
 0x101   : > { %1266 = vmatpush.bf16.msra.mxu1 %v2439_v47  ;;  %v1006_v14 = vadd.f32 %v1005_v53, %v993_v24  ;;  %v1040_v22 = vpop.f32.mrf.mxu1  ;;  %v1015_v47 = vsel %vm1014_vm0, %v928_v41, %v1012_v42  ;;  %v1158_v53 = vld [vmem:[#allocation4] sm:$0x3f] }
 0x102   : > { %1279 = vmatpush.bf16.msra.mxu2 %v2498_v13 }
 0x103   : > { %1254 = vmatmul.bf16.vlgmr.msra.gmra.mxu0 %v2585_v17  ;;  %v1013_v31 = vrot.slane %v1006_v14, 4 }
 0x104   : > { %1267 = vmatmul.bf16.vlgmr.msra.gmra.mxu1 %v2591_v29 }
 0x105   : > { %1280 = vmatmul.bf16.vlgmr.msra.gmra.mxu2 %v1164_v45  ;;  %v1017_v48 = vsel %vm1016_vm1, %v1015_v47, %v1013_v31 }
 0x106   : > { %v1019_v36 = vadd.f32 %v1017_v48, %v498_v26 }
 0x108   : > { %v1053_v37 = vpop.f32.mrf.mxu2  ;;  %1020 = vst [vmem:[#allocation2] sm:$0x3f] %v1019_v36  ;;  %v1007_v54 = vpop.f32.mrf.mxu0 }
 0x109   : > { %v1042_v2 = vpop.f32.mrf.mxu1  ;;  %v1054_v30 = vadd.f32 %v1053_v37, %v1040_v22 }
 0x10a   : > { %v1066_v1 = vpop.f32.mrf.mxu3 }
 0x10b   : > { %v1067_v29 = vadd.f32 %v1066_v1, %v1054_v30 }
 0x10f   : > { %v1298_v4 = vld [vmem:[#allocation2] sm:$0x3f] }
 0x110   : > { %v1055_v10 = vpop.f32.mrf.mxu2  ;;  %1299 = vst [vmem:[%s384_s27] sm:$0x3f] %v1298_v4 }
 0x112   : > { %v1068_v39 = vpop.f32.mrf.mxu3 }
 0x120   : > { %v1079_v35 = vpop.f32.mrf.mxu0 }
 0x121   : > { %v1092_v32 = vpop.f32.mrf.mxu1 }
 0x122   : > { %v1093_v60 = vadd.f32 %v1092_v32, %v1079_v35 }
 0x128   : > { %v1105_v0 = vpop.f32.mrf.mxu2  ;;  %v1081_v13 = vpop.f32.mrf.mxu0 }
 0x129   : > { %v1094_v63 = vpop.f32.mrf.mxu1  ;;  %v1106_v49 = vadd.f32 %v1105_v0, %v1093_v60 }
 0x12a   : > { %v1118_v15 = vpop.f32.mrf.mxu3 }
 0x12b   : > { %v1151_v16 = vrot.slane %v1106_v49, 6 }
 0x12d   : > { %v1153_v21 = vsel %vm1014_vm0, %v1067_v29, %v1151_v16 }
 0x130   : > { %v1107_v40 = vpop.f32.mrf.mxu2 }
 0x132   : > { %v1120_v18 = vpop.f32.mrf.mxu3 }
 0x140   : > { %v1131_v11 = vpop.f32.mrf.mxu0 }
 0x141   : > { %v1132_v3 = vadd.f32 %v1131_v11, %v1118_v15  ;;  %v1144_v7 = vpop.f32.mrf.mxu1 }
 0x143   : > { %v1145_v17 = vadd.f32 %v1144_v7, %v1132_v3 }
 0x145   : > { %v1152_v12 = vrot.slane %v1145_v17, 4 }
 0x147   : > { %v1154_v25 = vsel %vm1016_vm1, %v1153_v21, %v1152_v12 }
 0x148   : > { %v1177_v33 = vpop.f32.mrf.mxu2  ;;  %v1156_v34 = vadd.f32 %v1154_v25, %v1021_v8  ;;  %v1133_v38 = vpop.f32.mrf.mxu0 }
 0x149   : > { %v1146_v45 = vpop.f32.mrf.mxu1 }
 0x14a   : > { %v1190_v44 = vpop.f32.mrf.mxu3  ;;  %1157 = vst [vmem:[#allocation3] sm:$0x3f] %v1156_v34 }
 0x14b   : > { %v1191_v59 = vadd.f32 %v1190_v44, %v1177_v33 }
 0x150   : > { %v1179_v46 = vpop.f32.mrf.mxu2 }
 0x151   : > { %v1300_v50 = vld [vmem:[#allocation3] sm:$0x3f] }
 0x152   : > { %v1192_v56 = vpop.f32.mrf.mxu3  ;;  %1301 = vst [vmem:[%s389_s30] sm:$0x3f] %v1300_v50 }
 0x160   : > { %v1203_v57 = vpop.f32.mrf.mxu0 }
 0x161   : > { %v1216_v58 = vpop.f32.mrf.mxu1  ;;  %v1204_v42 = vadd.f32 %v1203_v57, %v1191_v59 }
 0x168   : > { %v1229_v62 = vpop.f32.mrf.mxu2  ;;  %v1205_v5 = vpop.f32.mrf.mxu0 }
 0x169   : > { %v1242_v6 = vpop.f32.mrf.mxu3  ;;  %v1218_v9 = vpop.f32.mrf.mxu1  ;;  %v1230_v28 = vadd.f32 %v1229_v62, %v1216_v58 }
 0x16b   : > { %v1243_v52 = vadd.f32 %v1242_v6, %v1230_v28 }
 0x16d   : > { %v1288_v61 = vrot.slane %v1243_v52, 6 }
 0x16f   : > { %v1290_v22 = vsel %vm1014_vm0, %v1204_v42, %v1288_v61 }
 0x170   : > { %v1231_v23 = vpop.f32.mrf.mxu2 }
 0x171   : > { %v1244_v27 = vpop.f32.mrf.mxu3 }
 0x180   : > { %v1255_v43 = vpop.f32.mrf.mxu0 }
 0x181   : > { %v1268_v51 = vpop.f32.mrf.mxu1 }
 0x182   : > { %v1269_v55 = vadd.f32 %v1268_v51, %v1255_v43 }
 0x188   : > { %v1281_v19 = vpop.f32.mrf.mxu2  ;;  %v1257_v20 = vpop.f32.mrf.mxu0 }
 0x189   : > { %v1282_v24 = vadd.f32 %v1281_v19, %v1269_v55  ;;  %v1270_v41 = vpop.f32.mrf.mxu1 }
 0x18b   : > { %v1289_v14 = vrot.slane %v1282_v24, 4 }
 0x18d   : > { %v1291_v26 = vsel %vm1016_vm1, %v1290_v22, %v1289_v14 }
 0x18e   : > { %v1293_v31 = vadd.f32 %v1291_v26, %v1158_v53 }
 0x190   : > { %1294 = vst [vmem:[#allocation4] sm:$0x3f] %v1293_v31  ;;  %v1283_v47 = vpop.f32.mrf.mxu2 }
 0x197   : > { %v1302_v48 = vld [vmem:[#allocation4] sm:$0x3f] }
 0x198   : > { %1303 = vst [vmem:[%s394_s10] sm:$0x3f] %v1302_v48 }
 0x199 PF: > { %s20_s26 = sadd.s32 1, %s1987_s26   ;;  %s2791_s21 = smov %s1971_s22 }
 0x19a   : > { %p17_p1 = scmp.ge.s32.totalorder %s20_s26, 4   ;;  %s2792_s22 = smov %s1975_s23 }
 0x19b   : > { %s2793_s23 = smov %s2072_s8  ;;  %s2794_s24 = smov %s1983_s25 }
 0x19c   : > { %s2795_s25 = smov %s2797_s28  ;;  %19 = sbr.rel (!%p17_p1) target bundleno = 4 (0x4), region = 117 }
 0x1a1   :  { %1357 = vsyncpa [#allocation6], 1 }
 0x1a2   :  { %1359 = vsyncpa [#allocation6 + $0x1], 1 }

</bundles_post_ra>
